<compile_context>
chip_gen: v7x
topology: tpu7x:2x2x1
jax: 0.10.0
libtpu: 0.0.40
codegen_flags: <defaults>
</compile_context>

<pallas_src>
import math
import functools

import jax
import jax.numpy as jnp
from jax import lax
from jax.experimental import pallas as pl
from jax.experimental.pallas import tpu as pltpu

PAD = 32


def _softplus(z):
    return jnp.maximum(z, 0.0) + jnp.log(1.0 + jnp.exp(-jnp.abs(z)))


# ----------------------------------------------------------------------------
# The fused kernel: one grid step == one encoder layer; step 0 also embeds,
# step L-1 also extracts the seq-0 rows and evaluates the box probabilities.
# ----------------------------------------------------------------------------
def fused_forward_kernel(
        tok_r_ref, tok_c_ref, pe_ref, emb_ref,
        wq_ref, bq_ref, wk_ref, bk_ref, wv_ref, bv_ref,
        wo_ref, bo_ref, ln1_g_ref, ln1_b_ref,
        w1_ref, b1_ref, w2_ref, b2_ref, ln2_g_ref, ln2_b_ref,
        bmin_ref, bdel_ref, cidx_ref, sidx_ref,
        pos_c_ref, pos_s_ref,
        h_ref,
        *, num_heads, seq_len, batch, dim):
    l = pl.program_id(0)
    n_layers = pl.num_programs(0)
    bs = batch * seq_len

    # Batch-id one-hot per row, built with range compares (no integer division,
    # no relayouts): bsel[r, b] = 1.0  iff  b*S <= r < (b+1)*S.
    r_iota = lax.broadcasted_iota(jnp.int32, (bs, batch), 0)
    b_iota = lax.broadcasted_iota(jnp.int32, (bs, batch), 1)
    bsel = jnp.logical_and(r_iota >= b_iota * seq_len,
                           r_iota < (b_iota + 1) * seq_len).astype(jnp.float32)

    # -------- step 0: embedding * sqrt(D) + positional encoding -------------
    @pl.when(l == 0)
    def _():
        tok_r = tok_r_ref[...]                                      # (BS, 1) i32
        vocab_iota = lax.broadcasted_iota(jnp.int32, (bs, emb_ref.shape[0]), 1)
        onehot = (tok_r == vocab_iota).astype(jnp.float32)          # (BS, V)
        emb = jnp.dot(onehot, emb_ref[...], preferred_element_type=jnp.float32)
        # Reference quirk: pos_encoding indexed by the BATCH index, broadcast
        # over the sequence positions of that batch row.
        pe_rows = jnp.dot(bsel, pe_ref[...], preferred_element_type=jnp.float32)
        h_ref[...] = emb * math.sqrt(dim) + pe_rows

    # -------- one encoder layer per grid step (weights streamed) ------------
    h = h_ref[...]                                                  # (BS, D) f32

    # Additive mask rebuilt in-kernel (never touches HBM): block-diagonal over
    # batches AND key-padding (x == PAD) on the key axis.
    same_batch = lax.dot_general(bsel, bsel, (((1,), (1,)), ((), ())),
                                 preferred_element_type=jnp.float32)
    not_pad = tok_c_ref[...] != PAD                                 # (1, BS)
    allowed = jnp.logical_and(same_batch > 0.5, not_pad)
    mask_add = jnp.where(allowed, 0.0, -1e30).astype(jnp.float32)   # (BS, BS)

    acc = jnp.zeros((bs, dim), jnp.float32)
    for hd in range(num_heads):      # static unroll, per-head weight slabs
        qh = jnp.dot(h, wq_ref[hd], preferred_element_type=jnp.float32) + bq_ref[hd]
        kh = jnp.dot(h, wk_ref[hd], preferred_element_type=jnp.float32) + bk_ref[hd]
        vh = jnp.dot(h, wv_ref[hd], preferred_element_type=jnp.float32) + bv_ref[hd]
        # q @ k^T without an XLU transpose: contract the last dims.
        s = lax.dot_general(qh, kh, (((1,), (1,)), ((), ())),
                            preferred_element_type=jnp.float32) + mask_add
        s = s - jnp.max(s, axis=-1, keepdims=True)
        p = jnp.exp(s)
        p = p * pl.reciprocal(jnp.sum(p, axis=-1, keepdims=True), approx=True)
        ctx = jnp.dot(p, vh, preferred_element_type=jnp.float32)    # (BS, Dh)
        # Accumulate directly through this head's slice of the output proj
        # (replaces jnp.concatenate(heads) + one big matmul; no lane concat).
        acc = acc + jnp.dot(ctx, wo_ref[hd], preferred_element_type=jnp.float32)
    attn = acc + bo_ref[...]

    def layernorm(y, g, b):
        mu = jnp.mean(y, axis=-1, keepdims=True)
        var = jnp.mean(y * y, axis=-1, keepdims=True) - mu * mu     # single pass
        return (y - mu) * lax.rsqrt(var + 1e-5) * g + b

    # Post-norm residual blocks (PyTorch default norm_first=False, relu FFN).
    y = layernorm(h + attn, ln1_g_ref[...], ln1_b_ref[...])
    f = jnp.maximum(
        jnp.dot(y, w1_ref[...], preferred_element_type=jnp.float32) + b1_ref[...],
        0.0)
    f = jnp.dot(f, w2_ref[...], preferred_element_type=jnp.float32) + b2_ref[...]
    h_ref[...] = layernorm(y + f, ln2_g_ref[...], ln2_b_ref[...])

    # -------- final step: seq-0 rows + fused box probabilities --------------
    @pl.when(l == n_layers - 1)
    def _():
        hf = h_ref[...]
        # Select row b*S of each batch via a one-hot matmul (no strided gather).
        r2 = lax.broadcasted_iota(jnp.int32, (batch, bs), 1)
        b2 = lax.broadcasted_iota(jnp.int32, (batch, bs), 0)
        sel0 = (r2 == b2 * seq_len).astype(jnp.float32)             # (B, BS)
        box_vec = jnp.dot(sel0, hf, preferred_element_type=jnp.float32)  # (B, D)
        d1 = dim // 2
        q_min = box_vec[:, :d1]
        q_max = q_min + _softplus(box_vec[:, d1:])

        n_ent = bmin_ref.shape[0]
        ent_iota = lax.broadcasted_iota(jnp.int32, (batch, n_ent), 1)

        def pos_prob(idx_ref):
            # TODO(synk): box_embedding_model is an external dependency with no
            # reference implementation; placeholder (min, softplus-delta) box
            # intersection probability: pos = vol(query ∩ entity) / vol(entity).
            oh = (idx_ref[...] == ent_iota).astype(jnp.float32)     # (B, E)
            e_min = jnp.dot(oh, bmin_ref[...], preferred_element_type=jnp.float32)
            e_delta = jnp.dot(oh, bdel_ref[...], preferred_element_type=jnp.float32)
            e_max = e_min + _softplus(e_delta)
            i_min = jnp.maximum(q_min, e_min)
            i_max = jnp.minimum(q_max, e_max)
            lv_i = jnp.sum(jnp.log(_softplus(i_max - i_min) + 1e-10),
                           axis=-1, keepdims=True)
            lv_e = jnp.sum(jnp.log(_softplus(e_max - e_min) + 1e-10),
                           axis=-1, keepdims=True)
            return jnp.clip(jnp.exp(lv_i - lv_e), 0.0, 1.0)          # (B, 1)

        pos_c_ref[...] = pos_prob(cidx_ref)
        pos_s_ref[...] = pos_prob(sidx_ref)


# ----------------------------------------------------------------------------
# Wrapper: one pallas_call for the whole TokenBoxEmbeddingModel forward.
# ----------------------------------------------------------------------------
def token_box_forward(x_tokens, color_idx, shape_idx, label, params):
    del label                                  # unused, as in the PyTorch forward
    B, S = x_tokens.shape
    sp = params["stack"]
    L, H, D, Dh = sp["wq"].shape
    FF = sp["w1"].shape[-1]
    E, Dhalf = params["box_min"].shape
    V = params["embedding"].shape[0]
    BS = B * S

    tok = x_tokens.reshape(BS).astype(jnp.int32)
    tok_r = tok.reshape(BS, 1)                 # rows: embedding one-hot
    tok_c = tok.reshape(1, BS)                 # cols: key-padding flags
    pe_b = params["pos_encoding"][:B]          # (B, D): batch-index quirk
    cidx = color_idx.reshape(B, 1).astype(jnp.int32)
    sidx = shape_idx.reshape(B, 1).astype(jnp.int32)

    def full(shape):
        n = len(shape)
        return pl.BlockSpec(shape, lambda l: (0,) * n)

    def per_layer(shape):
        n = len(shape)
        return pl.BlockSpec((None,) + shape, lambda l: (l,) + (0,) * n)

    in_specs = [
        full((BS, 1)), full((1, BS)), full((B, D)), full((V, D)),
        per_layer((H, D, Dh)), per_layer((H, 1, Dh)),   # wq, bq (scale folded)
        per_layer((H, D, Dh)), per_layer((H, 1, Dh)),   # wk, bk
        per_layer((H, D, Dh)), per_layer((H, 1, Dh)),   # wv, bv
        per_layer((H, Dh, D)), per_layer((1, D)),       # wo (per-head rows), bo
        per_layer((1, D)), per_layer((1, D)),           # ln1 gamma, beta
        per_layer((D, FF)), per_layer((1, FF)),         # w1, b1
        per_layer((FF, D)), per_layer((1, D)),          # w2, b2
        per_layer((1, D)), per_layer((1, D)),           # ln2 gamma, beta
        full((E, Dhalf)), full((E, Dhalf)),             # box tables (VMEM-resident)
        full((B, 1)), full((B, 1)),                     # color / shape indices
    ]
    out_specs = [pl.BlockSpec((B, 1), lambda l: (0, 0)),
                 pl.BlockSpec((B, 1), lambda l: (0, 0))]

    kernel = functools.partial(fused_forward_kernel,
                               num_heads=H, seq_len=S, batch=B, dim=D)

    pos_c, pos_s = pl.pallas_call(
        kernel,
        out_shape=(jax.ShapeDtypeStruct((B, 1), jnp.float32),
                   jax.ShapeDtypeStruct((B, 1), jnp.float32)),
        grid_spec=pltpu.PrefetchScalarGridSpec(
            num_scalar_prefetch=0,
            grid=(L,),                       # one encoder layer per grid step
            in_specs=in_specs,
            out_specs=out_specs,
            scratch_shapes=[pltpu.VMEM((BS, D), jnp.float32)]),  # activations
        compiler_params=pltpu.CompilerParams(
            dimension_semantics=("arbitrary",),      # layers are sequential
            vmem_limit_bytes=32 * 1024 * 1024),
    )(tok_r, tok_c, pe_b, params["embedding"],
      sp["wq"], sp["bq"], sp["wk"], sp["bk"], sp["wv"], sp["bv"],
      sp["wo"], sp["bo"], sp["ln1_g"], sp["ln1_b"],
      sp["w1"], sp["b1"], sp["w2"], sp["b2"], sp["ln2_g"], sp["ln2_b"],
      params["box_min"], params["box_delta"], cidx, sidx)

    pos_c = pos_c.reshape(B)
    pos_s = pos_s.reshape(B)
    return pos_c, 1.0 - pos_c, pos_s, 1.0 - pos_s


# ----------------------------------------------------------------------------
# Parameter preparation
# ----------------------------------------------------------------------------
def make_pos_encoding(max_len, dim):
    pos = jnp.arange(max_len, dtype=jnp.float32)[:, None]
    div = jnp.exp(jnp.arange(0, dim, 2, dtype=jnp.float32) * (-math.log(10000.0) / dim))
    pe = jnp.zeros((max_len, dim), jnp.float32)
    pe = pe.at[:, 0::2].set(jnp.sin(pos * div))
    pe = pe.at[:, 1::2].set(jnp.cos(pos * div))
    return pe


def init_layer(key, D, FF):
    # Right-multiply (D_in, D_out) layout; when importing PyTorch weights,
    # transpose and split in_proj_weight into Wq/Wk/Wv accordingly.
    ks = jax.random.split(key, 12)
    s = 0.1
    return dict(
        wq=jax.random.normal(ks[0], (D, D), jnp.float32) * s,
        bq=jax.random.normal(ks[1], (1, D), jnp.float32) * s,
        wk=jax.random.normal(ks[2], (D, D), jnp.float32) * s,
        bk=jax.random.normal(ks[3], (1, D), jnp.float32) * s,
        wv=jax.random.normal(ks[4], (D, D), jnp.float32) * s,
        bv=jax.random.normal(ks[5], (1, D), jnp.float32) * s,
        wo=jax.random.normal(ks[6], (D, D), jnp.float32) * s,
        bo=jax.random.normal(ks[7], (1, D), jnp.float32) * s,
        ln1_g=jnp.ones((1, D), jnp.float32), ln1_b=jnp.zeros((1, D), jnp.float32),
        w1=jax.random.normal(ks[8], (D, FF), jnp.float32) * s,
        b1=jax.random.normal(ks[9], (1, FF), jnp.float32) * s,
        w2=jax.random.normal(ks[10], (FF, D), jnp.float32) * s,
        b2=jax.random.normal(ks[11], (1, D), jnp.float32) * s,
        ln2_g=jnp.ones((1, D), jnp.float32), ln2_b=jnp.zeros((1, D), jnp.float32),
    )


def stack_layers(layers, num_heads):
    """Stack per-layer params into (L, ...) arrays in the head-split layout the
    kernel streams per grid step.  1/sqrt(Dh) is folded into Wq/bq host-side."""
    D = layers[0]["wq"].shape[0]
    Dh = D // num_heads
    scale = 1.0 / math.sqrt(Dh)

    def head_cols(w):   # (D, D) -> (H, D, Dh): per-head output columns
        return w.reshape(D, num_heads, Dh).transpose(1, 0, 2)

    def head_bias(b):   # (1, D) -> (H, 1, Dh)
        return b.reshape(num_heads, Dh)[:, None, :]

    def head_rows(w):   # (D, D) output projection -> (H, Dh, D): per-head input rows
        return w.reshape(num_heads, Dh, D)

    return dict(
        wq=jnp.stack([head_cols(lp["wq"] * scale) for lp in layers]),
        bq=jnp.stack([head_bias(lp["bq"] * scale) for lp in layers]),
        wk=jnp.stack([head_cols(lp["wk"]) for lp in layers]),
        bk=jnp.stack([head_bias(lp["bk"]) for lp in layers]),
        wv=jnp.stack([head_cols(lp["wv"]) for lp in layers]),
        bv=jnp.stack([head_bias(lp["bv"]) for lp in layers]),
        wo=jnp.stack([head_rows(lp["wo"]) for lp in layers]),
        bo=jnp.stack([lp["bo"] for lp in layers]),
        ln1_g=jnp.stack([lp["ln1_g"] for lp in layers]),
        ln1_b=jnp.stack([lp["ln1_b"] for lp in layers]),
        w1=jnp.stack([lp["w1"] for lp in layers]),
        b1=jnp.stack([lp["b1"] for lp in layers]),
        w2=jnp.stack([lp["w2"] for lp in layers]),
        b2=jnp.stack([lp["b2"] for lp in layers]),
        ln2_g=jnp.stack([lp["ln2_g"] for lp in layers]),
        ln2_b=jnp.stack([lp["ln2_b"] for lp in layers]),
    )


if __name__ == "__main__":
    B, S = 2, 8
    D, H, FF, L = 32, 4, 64, 2
    num_tokens = 40          # > PAD (=32), so PAD has an embedding row
    num_entities = 10

    key = jax.random.PRNGKey(0)
    keys = jax.random.split(key, 6 + L)
    k_emb, k_bmin, k_bdel, k_tok, k_ci, k_si = keys[:6]
    k_layers = keys[6:]

    layers = [init_layer(k, D, FF) for k in k_layers]
    params = dict(
        embedding=jax.random.normal(k_emb, (num_tokens, D), jnp.float32) * 0.1,
        pos_encoding=make_pos_encoding(5000, D),
        stack=stack_layers(layers, H),
        box_min=jax.random.normal(k_bmin, (num_entities, D // 2), jnp.float32) * 0.1,
        box_delta=jax.random.normal(k_bdel, (num_entities, D // 2), jnp.float32) * 0.1,
    )

    x = jax.random.randint(k_tok, (B, S), 0, num_tokens).astype(jnp.int32)
    x = x.at[:, -2:].set(PAD)    # include real padding tokens
    x = x.at[:, 0].set(1)        # at least one non-pad key per row
    color_idx = jax.random.randint(k_ci, (B,), 0, num_entities)
    shape_idx = jax.random.randint(k_si, (B,), 0, num_entities)
    label = jnp.zeros((B,), jnp.int32)   # unused by forward (interface fidelity)

    fwd = jax.jit(token_box_forward)
    outs = fwd(x, color_idx, shape_idx, label, params)
    jax.block_until_ready(outs)
    print("KERNEL_OK")
</pallas_src>

<mosaic_0001>
module attributes {stable_mosaic.version = 11 : i64} {
  func.func @fused_forward_kernel(%arg0: i32, %arg1: memref<16x1xi32, #tpu.memory_space<vmem>>, %arg2: memref<1x16xi32, #tpu.memory_space<vmem>>, %arg3: memref<2x32xf32, #tpu.memory_space<vmem>>, %arg4: memref<40x32xf32, #tpu.memory_space<vmem>>, %arg5: memref<1x4x32x8xf32, #tpu.memory_space<vmem>>, %arg6: memref<1x4x1x8xf32, #tpu.memory_space<vmem>>, %arg7: memref<1x4x32x8xf32, #tpu.memory_space<vmem>>, %arg8: memref<1x4x1x8xf32, #tpu.memory_space<vmem>>, %arg9: memref<1x4x32x8xf32, #tpu.memory_space<vmem>>, %arg10: memref<1x4x1x8xf32, #tpu.memory_space<vmem>>, %arg11: memref<1x4x8x32xf32, #tpu.memory_space<vmem>>, %arg12: memref<1x1x32xf32, #tpu.memory_space<vmem>>, %arg13: memref<1x1x32xf32, #tpu.memory_space<vmem>>, %arg14: memref<1x1x32xf32, #tpu.memory_space<vmem>>, %arg15: memref<1x32x64xf32, #tpu.memory_space<vmem>>, %arg16: memref<1x1x64xf32, #tpu.memory_space<vmem>>, %arg17: memref<1x64x32xf32, #tpu.memory_space<vmem>>, %arg18: memref<1x1x32xf32, #tpu.memory_space<vmem>>, %arg19: memref<1x1x32xf32, #tpu.memory_space<vmem>>, %arg20: memref<1x1x32xf32, #tpu.memory_space<vmem>>, %arg21: memref<10x16xf32, #tpu.memory_space<vmem>>, %arg22: memref<10x16xf32, #tpu.memory_space<vmem>>, %arg23: memref<2x1xi32, #tpu.memory_space<vmem>>, %arg24: memref<2x1xi32, #tpu.memory_space<vmem>>, %arg25: memref<2x1xf32, #tpu.memory_space<vmem>>, %arg26: memref<2x1xf32, #tpu.memory_space<vmem>>, %arg27: memref<16x32xf32, #tpu.memory_space<vmem>>) attributes {dimension_semantics = [#tpu.dimension_semantics<arbitrary>], iteration_bounds = array<i64: 2>, scalar_prefetch = 0 : i64, scratch_operands = 1 : i64, tpu.core_type = #tpu.core_type<tc>, window_params = [{pipeline_mode = #tpu.pipeline_mode<synchronous>, transform_indices = @transform_0, window_bounds = array<i64: 16, 1>}, {pipeline_mode = #tpu.pipeline_mode<synchronous>, transform_indices = @transform_1, window_bounds = array<i64: 1, 16>}, {pipeline_mode = #tpu.pipeline_mode<synchronous>, transform_indices = @transform_2, window_bounds = array<i64: 2, 32>}, {pipeline_mode = #tpu.pipeline_mode<synchronous>, transform_indices = @transform_3, window_bounds = array<i64: 40, 32>}, {transform_indices = @transform_4, window_bounds = array<i64: 1, 4, 32, 8>}, {transform_indices = @transform_5, window_bounds = array<i64: 1, 4, 1, 8>}, {transform_indices = @transform_6, window_bounds = array<i64: 1, 4, 32, 8>}, {transform_indices = @transform_7, window_bounds = array<i64: 1, 4, 1, 8>}, {transform_indices = @transform_8, window_bounds = array<i64: 1, 4, 32, 8>}, {transform_indices = @transform_9, window_bounds = array<i64: 1, 4, 1, 8>}, {transform_indices = @transform_10, window_bounds = array<i64: 1, 4, 8, 32>}, {transform_indices = @transform_11, window_bounds = array<i64: 1, 1, 32>}, {transform_indices = @transform_12, window_bounds = array<i64: 1, 1, 32>}, {transform_indices = @transform_13, window_bounds = array<i64: 1, 1, 32>}, {transform_indices = @transform_14, window_bounds = array<i64: 1, 32, 64>}, {transform_indices = @transform_15, window_bounds = array<i64: 1, 1, 64>}, {transform_indices = @transform_16, window_bounds = array<i64: 1, 64, 32>}, {transform_indices = @transform_17, window_bounds = array<i64: 1, 1, 32>}, {transform_indices = @transform_18, window_bounds = array<i64: 1, 1, 32>}, {transform_indices = @transform_19, window_bounds = array<i64: 1, 1, 32>}, {pipeline_mode = #tpu.pipeline_mode<synchronous>, transform_indices = @transform_20, window_bounds = array<i64: 10, 16>}, {pipeline_mode = #tpu.pipeline_mode<synchronous>, transform_indices = @transform_21, window_bounds = array<i64: 10, 16>}, {pipeline_mode = #tpu.pipeline_mode<synchronous>, transform_indices = @transform_22, window_bounds = array<i64: 2, 1>}, {pipeline_mode = #tpu.pipeline_mode<synchronous>, transform_indices = @transform_23, window_bounds = array<i64: 2, 1>}, {pipeline_mode = #tpu.pipeline_mode<synchronous>, transform_indices = @transform_24, window_bounds = array<i64: 2, 1>}, {pipeline_mode = #tpu.pipeline_mode<synchronous>, transform_indices = @transform_25, window_bounds = array<i64: 2, 1>}]} {
    %0 = tpu.iota {dimensions = array<i32: 0>} : vector<16x2xi32>
    %1 = tpu.iota {dimensions = array<i32: 1>} : vector<16x2xi32>
    %c8_i32 = arith.constant 8 : i32
    %2 = vector.broadcast %c8_i32 : i32 to vector<16x2xi32>
    %3 = arith.muli %1, %2 : vector<16x2xi32>
    %4 = arith.cmpi sge, %0, %3 : vector<16x2xi32>
    %c1_i32 = arith.constant 1 : i32
    %5 = vector.broadcast %c1_i32 : i32 to vector<16x2xi32>
    %6 = arith.addi %1, %5 : vector<16x2xi32>
    %c8_i32_0 = arith.constant 8 : i32
    %7 = vector.broadcast %c8_i32_0 : i32 to vector<16x2xi32>
    %8 = arith.muli %6, %7 : vector<16x2xi32>
    %9 = arith.cmpi slt, %0, %8 : vector<16x2xi32>
    %10 = arith.andi %4, %9 : vector<16x2xi1>
    %11 = arith.extui %10 : vector<16x2xi1> to vector<16x2xi32>
    %12 = arith.sitofp %11 : vector<16x2xi32> to vector<16x2xf32>
    %c0_i32 = arith.constant 0 : i32
    %13 = arith.cmpi eq, %arg0, %c0_i32 : i32
    %14 = arith.extui %13 : i1 to i32
    %c0_i32_1 = arith.constant 0 : i32
    %15 = arith.cmpi ne, %14, %c0_i32_1 : i32
    scf.if %15 {
      %c0_194 = arith.constant 0 : index
      %c0_195 = arith.constant 0 : index
      %259 = vector.load %arg1[%c0_194, %c0_195] : memref<16x1xi32, #tpu.memory_space<vmem>>, vector<16x1xi32>
      %260 = tpu.iota {dimensions = array<i32: 1>} : vector<16x40xi32>
      %261 = vector.broadcast %259 : vector<16x1xi32> to vector<16x40xi32>
      %262 = arith.cmpi eq, %261, %260 : vector<16x40xi32>
      %263 = arith.extui %262 : vector<16x40xi1> to vector<16x40xi32>
      %264 = arith.sitofp %263 : vector<16x40xi32> to vector<16x40xf32>
      %c0_196 = arith.constant 0 : index
      %c0_197 = arith.constant 0 : index
      %265 = vector.load %arg4[%c0_196, %c0_197] : memref<40x32xf32, #tpu.memory_space<vmem>>, vector<40x32xf32>
      %cst_198 = arith.constant dense<0.000000e+00> : vector<16x32xf32>
      %266 = tpu.matmul %264, %265, %cst_198 {dimension_numbers = #tpu.dot_dimension_numbers<[1], [0], [0], [1], [0, 0, 1, 1], [], []>} : vector<16x40xf32>, vector<40x32xf32>, vector<16x32xf32> -> vector<16x32xf32>
      %c0_199 = arith.constant 0 : index
      %c0_200 = arith.constant 0 : index
      %267 = vector.load %arg3[%c0_199, %c0_200] : memref<2x32xf32, #tpu.memory_space<vmem>>, vector<2x32xf32>
      %cst_201 = arith.constant dense<0.000000e+00> : vector<16x32xf32>
      %268 = tpu.matmul %12, %267, %cst_201 {dimension_numbers = #tpu.dot_dimension_numbers<[1], [0], [0], [1], [0, 0, 1, 1], [], []>} : vector<16x2xf32>, vector<2x32xf32>, vector<16x32xf32> -> vector<16x32xf32>
      %cst_202 = arith.constant 5.65685415 : f32
      %269 = vector.broadcast %cst_202 : f32 to vector<16x32xf32>
      %270 = arith.mulf %266, %269 : vector<16x32xf32>
      %271 = arith.addf %270, %268 : vector<16x32xf32>
      %c0_203 = arith.constant 0 : index
      %c0_204 = arith.constant 0 : index
      %272 = vector.load %arg27[%c0_203, %c0_204] : memref<16x32xf32, #tpu.memory_space<vmem>>, vector<16x32xf32>
      tpu.vector_store %arg27[%c0_203, %c0_204], %271 {strides = array<i32>} : memref<16x32xf32, #tpu.memory_space<vmem>>, vector<16x32xf32>,
    } else {
    }
    %c0 = arith.constant 0 : index
    %c0_2 = arith.constant 0 : index
    %16 = vector.load %arg27[%c0, %c0_2] : memref<16x32xf32, #tpu.memory_space<vmem>>, vector<16x32xf32>
    %cst = arith.constant dense<0.000000e+00> : vector<16x16xf32>
    %17 = tpu.matmul %12, %12, %cst {dimension_numbers = #tpu.dot_dimension_numbers<[1], [1], [0], [0], [0, 0, 1, 0], [], []>} : vector<16x2xf32>, vector<16x2xf32>, vector<16x16xf32> -> vector<16x16xf32>
    %c0_3 = arith.constant 0 : index
    %c0_4 = arith.constant 0 : index
    %18 = vector.load %arg2[%c0_3, %c0_4] : memref<1x16xi32, #tpu.memory_space<vmem>>, vector<1x16xi32>
    %c32_i32 = arith.constant 32 : i32
    %19 = vector.broadcast %c32_i32 : i32 to vector<1x16xi32>
    %20 = arith.cmpi ne, %18, %19 : vector<1x16xi32>
    %cst_5 = arith.constant 5.000000e-01 : f32
    %21 = vector.broadcast %cst_5 : f32 to vector<16x16xf32>
    %22 = arith.cmpf ogt, %17, %21 : vector<16x16xf32>
    %23 = vector.broadcast %20 : vector<1x16xi1> to vector<16x16xi1>
    %24 = arith.andi %22, %23 : vector<16x16xi1>
    %cst_6 = arith.constant 0.000000e+00 : f32
    %cst_7 = arith.constant -1.000000e+30 : f32
    %25 = vector.broadcast %cst_6 : f32 to vector<16x16xf32>
    %26 = vector.broadcast %cst_7 : f32 to vector<16x16xf32>
    %27 = arith.select %24, %25, %26 : vector<16x16xi1>, vector<16x16xf32>
    %cst_8 = arith.constant 0.000000e+00 : f32
    %28 = vector.broadcast %cst_8 : f32 to vector<16x32xf32>
    %c0_9 = arith.constant 0 : index
    %c0_10 = arith.constant 0 : index
    %c0_11 = arith.constant 0 : index
    %c0_12 = arith.constant 0 : index
    %29 = vector.load %arg5[%c0_9, %c0_10, %c0_11, %c0_12] : memref<1x4x32x8xf32, #tpu.memory_space<vmem>>, vector<1x1x32x8xf32>
    %30 = vector.shape_cast %29 : vector<1x1x32x8xf32> to vector<32x8xf32>
    %cst_13 = arith.constant dense<0.000000e+00> : vector<16x8xf32>
    %31 = tpu.matmul %16, %30, %cst_13 {dimension_numbers = #tpu.dot_dimension_numbers<[1], [0], [0], [1], [0, 0, 1, 1], [], []>} : vector<16x32xf32>, vector<32x8xf32>, vector<16x8xf32> -> vector<16x8xf32>
    %c0_14 = arith.constant 0 : index
    %c0_15 = arith.constant 0 : index
    %c0_16 = arith.constant 0 : index
    %c0_17 = arith.constant 0 : index
    %32 = vector.load %arg6[%c0_14, %c0_15, %c0_16, %c0_17] : memref<1x4x1x8xf32, #tpu.memory_space<vmem>>, vector<1x1x1x8xf32>
    %33 = vector.shape_cast %32 : vector<1x1x1x8xf32> to vector<1x8xf32>
    %34 = vector.broadcast %33 : vector<1x8xf32> to vector<16x8xf32>
    %35 = arith.addf %31, %34 : vector<16x8xf32>
    %c0_18 = arith.constant 0 : index
    %c0_19 = arith.constant 0 : index
    %c0_20 = arith.constant 0 : index
    %c0_21 = arith.constant 0 : index
    %36 = vector.load %arg7[%c0_18, %c0_19, %c0_20, %c0_21] : memref<1x4x32x8xf32, #tpu.memory_space<vmem>>, vector<1x1x32x8xf32>
    %37 = vector.shape_cast %36 : vector<1x1x32x8xf32> to vector<32x8xf32>
    %cst_22 = arith.constant dense<0.000000e+00> : vector<16x8xf32>
    %38 = tpu.matmul %16, %37, %cst_22 {dimension_numbers = #tpu.dot_dimension_numbers<[1], [0], [0], [1], [0, 0, 1, 1], [], []>} : vector<16x32xf32>, vector<32x8xf32>, vector<16x8xf32> -> vector<16x8xf32>
    %c0_23 = arith.constant 0 : index
    %c0_24 = arith.constant 0 : index
    %c0_25 = arith.constant 0 : index
    %c0_26 = arith.constant 0 : index
    %39 = vector.load %arg8[%c0_23, %c0_24, %c0_25, %c0_26] : memref<1x4x1x8xf32, #tpu.memory_space<vmem>>, vector<1x1x1x8xf32>
    %40 = vector.shape_cast %39 : vector<1x1x1x8xf32> to vector<1x8xf32>
    %41 = vector.broadcast %40 : vector<1x8xf32> to vector<16x8xf32>
    %42 = arith.addf %38, %41 : vector<16x8xf32>
    %c0_27 = arith.constant 0 : index
    %c0_28 = arith.constant 0 : index
    %c0_29 = arith.constant 0 : index
    %c0_30 = arith.constant 0 : index
    %43 = vector.load %arg9[%c0_27, %c0_28, %c0_29, %c0_30] : memref<1x4x32x8xf32, #tpu.memory_space<vmem>>, vector<1x1x32x8xf32>
    %44 = vector.shape_cast %43 : vector<1x1x32x8xf32> to vector<32x8xf32>
    %cst_31 = arith.constant dense<0.000000e+00> : vector<16x8xf32>
    %45 = tpu.matmul %16, %44, %cst_31 {dimension_numbers = #tpu.dot_dimension_numbers<[1], [0], [0], [1], [0, 0, 1, 1], [], []>} : vector<16x32xf32>, vector<32x8xf32>, vector<16x8xf32> -> vector<16x8xf32>
    %c0_32 = arith.constant 0 : index
    %c0_33 = arith.constant 0 : index
    %c0_34 = arith.constant 0 : index
    %c0_35 = arith.constant 0 : index
    %46 = vector.load %arg10[%c0_32, %c0_33, %c0_34, %c0_35] : memref<1x4x1x8xf32, #tpu.memory_space<vmem>>, vector<1x1x1x8xf32>
    %47 = vector.shape_cast %46 : vector<1x1x1x8xf32> to vector<1x8xf32>
    %48 = vector.broadcast %47 : vector<1x8xf32> to vector<16x8xf32>
    %49 = arith.addf %45, %48 : vector<16x8xf32>
    %cst_36 = arith.constant dense<0.000000e+00> : vector<16x16xf32>
    %50 = tpu.matmul %35, %42, %cst_36 {dimension_numbers = #tpu.dot_dimension_numbers<[1], [1], [0], [0], [0, 0, 1, 0], [], []>} : vector<16x8xf32>, vector<16x8xf32>, vector<16x16xf32> -> vector<16x16xf32>
    %51 = arith.addf %50, %27 : vector<16x16xf32>
    %cst_37 = arith.constant dense<0xFF800000> : vector<16xf32>
    %52 = vector.multi_reduction <maximumf>, %51, %cst_37 [1] : vector<16x16xf32> to vector<16xf32>
    %53 = vector.shape_cast %52 : vector<16xf32> to vector<16x1xf32>
    %54 = vector.broadcast %53 : vector<16x1xf32> to vector<16x16xf32>
    %55 = arith.subf %51, %54 : vector<16x16xf32>
    %56 = math.exp %55 : vector<16x16xf32>
    %cst_38 = arith.constant dense<0.000000e+00> : vector<16xf32>
    %57 = vector.multi_reduction <add>, %56, %cst_38 [1] : vector<16x16xf32> to vector<16xf32>
    %58 = vector.shape_cast %57 : vector<16xf32> to vector<16x1xf32>
    %59 = tpu.reciprocal %58 {approx = true} : vector<16x1xf32> -> vector<16x1xf32>
    %60 = vector.broadcast %59 : vector<16x1xf32> to vector<16x16xf32>
    %61 = arith.mulf %56, %60 : vector<16x16xf32>
    %cst_39 = arith.constant dense<0.000000e+00> : vector<16x8xf32>
    %62 = tpu.matmul %61, %49, %cst_39 {dimension_numbers = #tpu.dot_dimension_numbers<[1], [0], [0], [1], [0, 0, 1, 1], [], []>} : vector<16x16xf32>, vector<16x8xf32>, vector<16x8xf32> -> vector<16x8xf32>
    %c0_40 = arith.constant 0 : index
    %c0_41 = arith.constant 0 : index
    %c0_42 = arith.constant 0 : index
    %c0_43 = arith.constant 0 : index
    %63 = vector.load %arg11[%c0_40, %c0_41, %c0_42, %c0_43] : memref<1x4x8x32xf32, #tpu.memory_space<vmem>>, vector<1x1x8x32xf32>
    %64 = vector.shape_cast %63 : vector<1x1x8x32xf32> to vector<8x32xf32>
    %cst_44 = arith.constant dense<0.000000e+00> : vector<16x32xf32>
    %65 = tpu.matmul %62, %64, %cst_44 {dimension_numbers = #tpu.dot_dimension_numbers<[1], [0], [0], [1], [0, 0, 1, 1], [], []>} : vector<16x8xf32>, vector<8x32xf32>, vector<16x32xf32> -> vector<16x32xf32>
    %66 = arith.addf %28, %65 : vector<16x32xf32>
    %c0_45 = arith.constant 0 : index
    %c1 = arith.constant 1 : index
    %c0_46 = arith.constant 0 : index
    %c0_47 = arith.constant 0 : index
    %67 = vector.load %arg5[%c0_45, %c1, %c0_46, %c0_47] : memref<1x4x32x8xf32, #tpu.memory_space<vmem>>, vector<1x1x32x8xf32>
    %68 = vector.shape_cast %67 : vector<1x1x32x8xf32> to vector<32x8xf32>
    %cst_48 = arith.constant dense<0.000000e+00> : vector<16x8xf32>
    %69 = tpu.matmul %16, %68, %cst_48 {dimension_numbers = #tpu.dot_dimension_numbers<[1], [0], [0], [1], [0, 0, 1, 1], [], []>} : vector<16x32xf32>, vector<32x8xf32>, vector<16x8xf32> -> vector<16x8xf32>
    %c0_49 = arith.constant 0 : index
    %c1_50 = arith.constant 1 : index
    %c0_51 = arith.constant 0 : index
    %c0_52 = arith.constant 0 : index
    %70 = vector.load %arg6[%c0_49, %c1_50, %c0_51, %c0_52] : memref<1x4x1x8xf32, #tpu.memory_space<vmem>>, vector<1x1x1x8xf32>
    %71 = vector.shape_cast %70 : vector<1x1x1x8xf32> to vector<1x8xf32>
    %72 = vector.broadcast %71 : vector<1x8xf32> to vector<16x8xf32>
    %73 = arith.addf %69, %72 : vector<16x8xf32>
    %c0_53 = arith.constant 0 : index
    %c1_54 = arith.constant 1 : index
    %c0_55 = arith.constant 0 : index
    %c0_56 = arith.constant 0 : index
    %74 = vector.load %arg7[%c0_53, %c1_54, %c0_55, %c0_56] : memref<1x4x32x8xf32, #tpu.memory_space<vmem>>, vector<1x1x32x8xf32>
    %75 = vector.shape_cast %74 : vector<1x1x32x8xf32> to vector<32x8xf32>
    %cst_57 = arith.constant dense<0.000000e+00> : vector<16x8xf32>
    %76 = tpu.matmul %16, %75, %cst_57 {dimension_numbers = #tpu.dot_dimension_numbers<[1], [0], [0], [1], [0, 0, 1, 1], [], []>} : vector<16x32xf32>, vector<32x8xf32>, vector<16x8xf32> -> vector<16x8xf32>
    %c0_58 = arith.constant 0 : index
    %c1_59 = arith.constant 1 : index
    %c0_60 = arith.constant 0 : index
    %c0_61 = arith.constant 0 : index
    %77 = vector.load %arg8[%c0_58, %c1_59, %c0_60, %c0_61] : memref<1x4x1x8xf32, #tpu.memory_space<vmem>>, vector<1x1x1x8xf32>
    %78 = vector.shape_cast %77 : vector<1x1x1x8xf32> to vector<1x8xf32>
    %79 = vector.broadcast %78 : vector<1x8xf32> to vector<16x8xf32>
    %80 = arith.addf %76, %79 : vector<16x8xf32>
    %c0_62 = arith.constant 0 : index
    %c1_63 = arith.constant 1 : index
    %c0_64 = arith.constant 0 : index
    %c0_65 = arith.constant 0 : index
    %81 = vector.load %arg9[%c0_62, %c1_63, %c0_64, %c0_65] : memref<1x4x32x8xf32, #tpu.memory_space<vmem>>, vector<1x1x32x8xf32>
    %82 = vector.shape_cast %81 : vector<1x1x32x8xf32> to vector<32x8xf32>
    %cst_66 = arith.constant dense<0.000000e+00> : vector<16x8xf32>
    %83 = tpu.matmul %16, %82, %cst_66 {dimension_numbers = #tpu.dot_dimension_numbers<[1], [0], [0], [1], [0, 0, 1, 1], [], []>} : vector<16x32xf32>, vector<32x8xf32>, vector<16x8xf32> -> vector<16x8xf32>
    %c0_67 = arith.constant 0 : index
    %c1_68 = arith.constant 1 : index
    %c0_69 = arith.constant 0 : index
    %c0_70 = arith.constant 0 : index
    %84 = vector.load %arg10[%c0_67, %c1_68, %c0_69, %c0_70] : memref<1x4x1x8xf32, #tpu.memory_space<vmem>>, vector<1x1x1x8xf32>
    %85 = vector.shape_cast %84 : vector<1x1x1x8xf32> to vector<1x8xf32>
    %86 = vector.broadcast %85 : vector<1x8xf32> to vector<16x8xf32>
    %87 = arith.addf %83, %86 : vector<16x8xf32>
    %cst_71 = arith.constant dense<0.000000e+00> : vector<16x16xf32>
    %88 = tpu.matmul %73, %80, %cst_71 {dimension_numbers = #tpu.dot_dimension_numbers<[1], [1], [0], [0], [0, 0, 1, 0], [], []>} : vector<16x8xf32>, vector<16x8xf32>, vector<16x16xf32> -> vector<16x16xf32>
    %89 = arith.addf %88, %27 : vector<16x16xf32>
    %cst_72 = arith.constant dense<0xFF800000> : vector<16xf32>
    %90 = vector.multi_reduction <maximumf>, %89, %cst_72 [1] : vector<16x16xf32> to vector<16xf32>
    %91 = vector.shape_cast %90 : vector<16xf32> to vector<16x1xf32>
    %92 = vector.broadcast %91 : vector<16x1xf32> to vector<16x16xf32>
    %93 = arith.subf %89, %92 : vector<16x16xf32>
    %94 = math.exp %93 : vector<16x16xf32>
    %cst_73 = arith.constant dense<0.000000e+00> : vector<16xf32>
    %95 = vector.multi_reduction <add>, %94, %cst_73 [1] : vector<16x16xf32> to vector<16xf32>
    %96 = vector.shape_cast %95 : vector<16xf32> to vector<16x1xf32>
    %97 = tpu.reciprocal %96 {approx = true} : vector<16x1xf32> -> vector<16x1xf32>
    %98 = vector.broadcast %97 : vector<16x1xf32> to vector<16x16xf32>
    %99 = arith.mulf %94, %98 : vector<16x16xf32>
    %cst_74 = arith.constant dense<0.000000e+00> : vector<16x8xf32>
    %100 = tpu.matmul %99, %87, %cst_74 {dimension_numbers = #tpu.dot_dimension_numbers<[1], [0], [0], [1], [0, 0, 1, 1], [], []>} : vector<16x16xf32>, vector<16x8xf32>, vector<16x8xf32> -> vector<16x8xf32>
    %c0_75 = arith.constant 0 : index
    %c1_76 = arith.constant 1 : index
    %c0_77 = arith.constant 0 : index
    %c0_78 = arith.constant 0 : index
    %101 = vector.load %arg11[%c0_75, %c1_76, %c0_77, %c0_78] : memref<1x4x8x32xf32, #tpu.memory_space<vmem>>, vector<1x1x8x32xf32>
    %102 = vector.shape_cast %101 : vector<1x1x8x32xf32> to vector<8x32xf32>
    %cst_79 = arith.constant dense<0.000000e+00> : vector<16x32xf32>
    %103 = tpu.matmul %100, %102, %cst_79 {dimension_numbers = #tpu.dot_dimension_numbers<[1], [0], [0], [1], [0, 0, 1, 1], [], []>} : vector<16x8xf32>, vector<8x32xf32>, vector<16x32xf32> -> vector<16x32xf32>
    %104 = arith.addf %66, %103 : vector<16x32xf32>
    %c0_80 = arith.constant 0 : index
    %c2 = arith.constant 2 : index
    %c0_81 = arith.constant 0 : index
    %c0_82 = arith.constant 0 : index
    %105 = vector.load %arg5[%c0_80, %c2, %c0_81, %c0_82] : memref<1x4x32x8xf32, #tpu.memory_space<vmem>>, vector<1x1x32x8xf32>
    %106 = vector.shape_cast %105 : vector<1x1x32x8xf32> to vector<32x8xf32>
    %cst_83 = arith.constant dense<0.000000e+00> : vector<16x8xf32>
    %107 = tpu.matmul %16, %106, %cst_83 {dimension_numbers = #tpu.dot_dimension_numbers<[1], [0], [0], [1], [0, 0, 1, 1], [], []>} : vector<16x32xf32>, vector<32x8xf32>, vector<16x8xf32> -> vector<16x8xf32>
    %c0_84 = arith.constant 0 : index
    %c2_85 = arith.constant 2 : index
    %c0_86 = arith.constant 0 : index
    %c0_87 = arith.constant 0 : index
    %108 = vector.load %arg6[%c0_84, %c2_85, %c0_86, %c0_87] : memref<1x4x1x8xf32, #tpu.memory_space<vmem>>, vector<1x1x1x8xf32>
    %109 = vector.shape_cast %108 : vector<1x1x1x8xf32> to vector<1x8xf32>
    %110 = vector.broadcast %109 : vector<1x8xf32> to vector<16x8xf32>
    %111 = arith.addf %107, %110 : vector<16x8xf32>
    %c0_88 = arith.constant 0 : index
    %c2_89 = arith.constant 2 : index
    %c0_90 = arith.constant 0 : index
    %c0_91 = arith.constant 0 : index
    %112 = vector.load %arg7[%c0_88, %c2_89, %c0_90, %c0_91] : memref<1x4x32x8xf32, #tpu.memory_space<vmem>>, vector<1x1x32x8xf32>
    %113 = vector.shape_cast %112 : vector<1x1x32x8xf32> to vector<32x8xf32>
    %cst_92 = arith.constant dense<0.000000e+00> : vector<16x8xf32>
    %114 = tpu.matmul %16, %113, %cst_92 {dimension_numbers = #tpu.dot_dimension_numbers<[1], [0], [0], [1], [0, 0, 1, 1], [], []>} : vector<16x32xf32>, vector<32x8xf32>, vector<16x8xf32> -> vector<16x8xf32>
    %c0_93 = arith.constant 0 : index
    %c2_94 = arith.constant 2 : index
    %c0_95 = arith.constant 0 : index
    %c0_96 = arith.constant 0 : index
    %115 = vector.load %arg8[%c0_93, %c2_94, %c0_95, %c0_96] : memref<1x4x1x8xf32, #tpu.memory_space<vmem>>, vector<1x1x1x8xf32>
    %116 = vector.shape_cast %115 : vector<1x1x1x8xf32> to vector<1x8xf32>
    %117 = vector.broadcast %116 : vector<1x8xf32> to vector<16x8xf32>
    %118 = arith.addf %114, %117 : vector<16x8xf32>
    %c0_97 = arith.constant 0 : index
    %c2_98 = arith.constant 2 : index
    %c0_99 = arith.constant 0 : index
    %c0_100 = arith.constant 0 : index
    %119 = vector.load %arg9[%c0_97, %c2_98, %c0_99, %c0_100] : memref<1x4x32x8xf32, #tpu.memory_space<vmem>>, vector<1x1x32x8xf32>
    %120 = vector.shape_cast %119 : vector<1x1x32x8xf32> to vector<32x8xf32>
    %cst_101 = arith.constant dense<0.000000e+00> : vector<16x8xf32>
    %121 = tpu.matmul %16, %120, %cst_101 {dimension_numbers = #tpu.dot_dimension_numbers<[1], [0], [0], [1], [0, 0, 1, 1], [], []>} : vector<16x32xf32>, vector<32x8xf32>, vector<16x8xf32> -> vector<16x8xf32>
    %c0_102 = arith.constant 0 : index
    %c2_103 = arith.constant 2 : index
    %c0_104 = arith.constant 0 : index
    %c0_105 = arith.constant 0 : index
    %122 = vector.load %arg10[%c0_102, %c2_103, %c0_104, %c0_105] : memref<1x4x1x8xf32, #tpu.memory_space<vmem>>, vector<1x1x1x8xf32>
    %123 = vector.shape_cast %122 : vector<1x1x1x8xf32> to vector<1x8xf32>
    %124 = vector.broadcast %123 : vector<1x8xf32> to vector<16x8xf32>
    %125 = arith.addf %121, %124 : vector<16x8xf32>
    %cst_106 = arith.constant dense<0.000000e+00> : vector<16x16xf32>
    %126 = tpu.matmul %111, %118, %cst_106 {dimension_numbers = #tpu.dot_dimension_numbers<[1], [1], [0], [0], [0, 0, 1, 0], [], []>} : vector<16x8xf32>, vector<16x8xf32>, vector<16x16xf32> -> vector<16x16xf32>
    %127 = arith.addf %126, %27 : vector<16x16xf32>
    %cst_107 = arith.constant dense<0xFF800000> : vector<16xf32>
    %128 = vector.multi_reduction <maximumf>, %127, %cst_107 [1] : vector<16x16xf32> to vector<16xf32>
    %129 = vector.shape_cast %128 : vector<16xf32> to vector<16x1xf32>
    %130 = vector.broadcast %129 : vector<16x1xf32> to vector<16x16xf32>
    %131 = arith.subf %127, %130 : vector<16x16xf32>
    %132 = math.exp %131 : vector<16x16xf32>
    %cst_108 = arith.constant dense<0.000000e+00> : vector<16xf32>
    %133 = vector.multi_reduction <add>, %132, %cst_108 [1] : vector<16x16xf32> to vector<16xf32>
    %134 = vector.shape_cast %133 : vector<16xf32> to vector<16x1xf32>
    %135 = tpu.reciprocal %134 {approx = true} : vector<16x1xf32> -> vector<16x1xf32>
    %136 = vector.broadcast %135 : vector<16x1xf32> to vector<16x16xf32>
    %137 = arith.mulf %132, %136 : vector<16x16xf32>
    %cst_109 = arith.constant dense<0.000000e+00> : vector<16x8xf32>
    %138 = tpu.matmul %137, %125, %cst_109 {dimension_numbers = #tpu.dot_dimension_numbers<[1], [0], [0], [1], [0, 0, 1, 1], [], []>} : vector<16x16xf32>, vector<16x8xf32>, vector<16x8xf32> -> vector<16x8xf32>
    %c0_110 = arith.constant 0 : index
    %c2_111 = arith.constant 2 : index
    %c0_112 = arith.constant 0 : index
    %c0_113 = arith.constant 0 : index
    %139 = vector.load %arg11[%c0_110, %c2_111, %c0_112, %c0_113] : memref<1x4x8x32xf32, #tpu.memory_space<vmem>>, vector<1x1x8x32xf32>
    %140 = vector.shape_cast %139 : vector<1x1x8x32xf32> to vector<8x32xf32>
    %cst_114 = arith.constant dense<0.000000e+00> : vector<16x32xf32>
    %141 = tpu.matmul %138, %140, %cst_114 {dimension_numbers = #tpu.dot_dimension_numbers<[1], [0], [0], [1], [0, 0, 1, 1], [], []>} : vector<16x8xf32>, vector<8x32xf32>, vector<16x32xf32> -> vector<16x32xf32>
    %142 = arith.addf %104, %141 : vector<16x32xf32>
    %c0_115 = arith.constant 0 : index
    %c3 = arith.constant 3 : index
    %c0_116 = arith.constant 0 : index
    %c0_117 = arith.constant 0 : index
    %143 = vector.load %arg5[%c0_115, %c3, %c0_116, %c0_117] : memref<1x4x32x8xf32, #tpu.memory_space<vmem>>, vector<1x1x32x8xf32>
    %144 = vector.shape_cast %143 : vector<1x1x32x8xf32> to vector<32x8xf32>
    %cst_118 = arith.constant dense<0.000000e+00> : vector<16x8xf32>
    %145 = tpu.matmul %16, %144, %cst_118 {dimension_numbers = #tpu.dot_dimension_numbers<[1], [0], [0], [1], [0, 0, 1, 1], [], []>} : vector<16x32xf32>, vector<32x8xf32>, vector<16x8xf32> -> vector<16x8xf32>
    %c0_119 = arith.constant 0 : index
    %c3_120 = arith.constant 3 : index
    %c0_121 = arith.constant 0 : index
    %c0_122 = arith.constant 0 : index
    %146 = vector.load %arg6[%c0_119, %c3_120, %c0_121, %c0_122] : memref<1x4x1x8xf32, #tpu.memory_space<vmem>>, vector<1x1x1x8xf32>
    %147 = vector.shape_cast %146 : vector<1x1x1x8xf32> to vector<1x8xf32>
    %148 = vector.broadcast %147 : vector<1x8xf32> to vector<16x8xf32>
    %149 = arith.addf %145, %148 : vector<16x8xf32>
    %c0_123 = arith.constant 0 : index
    %c3_124 = arith.constant 3 : index
    %c0_125 = arith.constant 0 : index
    %c0_126 = arith.constant 0 : index
    %150 = vector.load %arg7[%c0_123, %c3_124, %c0_125, %c0_126] : memref<1x4x32x8xf32, #tpu.memory_space<vmem>>, vector<1x1x32x8xf32>
    %151 = vector.shape_cast %150 : vector<1x1x32x8xf32> to vector<32x8xf32>
    %cst_127 = arith.constant dense<0.000000e+00> : vector<16x8xf32>
    %152 = tpu.matmul %16, %151, %cst_127 {dimension_numbers = #tpu.dot_dimension_numbers<[1], [0], [0], [1], [0, 0, 1, 1], [], []>} : vector<16x32xf32>, vector<32x8xf32>, vector<16x8xf32> -> vector<16x8xf32>
    %c0_128 = arith.constant 0 : index
    %c3_129 = arith.constant 3 : index
    %c0_130 = arith.constant 0 : index
    %c0_131 = arith.constant 0 : index
    %153 = vector.load %arg8[%c0_128, %c3_129, %c0_130, %c0_131] : memref<1x4x1x8xf32, #tpu.memory_space<vmem>>, vector<1x1x1x8xf32>
    %154 = vector.shape_cast %153 : vector<1x1x1x8xf32> to vector<1x8xf32>
    %155 = vector.broadcast %154 : vector<1x8xf32> to vector<16x8xf32>
    %156 = arith.addf %152, %155 : vector<16x8xf32>
    %c0_132 = arith.constant 0 : index
    %c3_133 = arith.constant 3 : index
    %c0_134 = arith.constant 0 : index
    %c0_135 = arith.constant 0 : index
    %157 = vector.load %arg9[%c0_132, %c3_133, %c0_134, %c0_135] : memref<1x4x32x8xf32, #tpu.memory_space<vmem>>, vector<1x1x32x8xf32>
    %158 = vector.shape_cast %157 : vector<1x1x32x8xf32> to vector<32x8xf32>
    %cst_136 = arith.constant dense<0.000000e+00> : vector<16x8xf32>
    %159 = tpu.matmul %16, %158, %cst_136 {dimension_numbers = #tpu.dot_dimension_numbers<[1], [0], [0], [1], [0, 0, 1, 1], [], []>} : vector<16x32xf32>, vector<32x8xf32>, vector<16x8xf32> -> vector<16x8xf32>
    %c0_137 = arith.constant 0 : index
    %c3_138 = arith.constant 3 : index
    %c0_139 = arith.constant 0 : index
    %c0_140 = arith.constant 0 : index
    %160 = vector.load %arg10[%c0_137, %c3_138, %c0_139, %c0_140] : memref<1x4x1x8xf32, #tpu.memory_space<vmem>>, vector<1x1x1x8xf32>
    %161 = vector.shape_cast %160 : vector<1x1x1x8xf32> to vector<1x8xf32>
    %162 = vector.broadcast %161 : vector<1x8xf32> to vector<16x8xf32>
    %163 = arith.addf %159, %162 : vector<16x8xf32>
    %cst_141 = arith.constant dense<0.000000e+00> : vector<16x16xf32>
    %164 = tpu.matmul %149, %156, %cst_141 {dimension_numbers = #tpu.dot_dimension_numbers<[1], [1], [0], [0], [0, 0, 1, 0], [], []>} : vector<16x8xf32>, vector<16x8xf32>, vector<16x16xf32> -> vector<16x16xf32>
    %165 = arith.addf %164, %27 : vector<16x16xf32>
    %cst_142 = arith.constant dense<0xFF800000> : vector<16xf32>
    %166 = vector.multi_reduction <maximumf>, %165, %cst_142 [1] : vector<16x16xf32> to vector<16xf32>
    %167 = vector.shape_cast %166 : vector<16xf32> to vector<16x1xf32>
    %168 = vector.broadcast %167 : vector<16x1xf32> to vector<16x16xf32>
    %169 = arith.subf %165, %168 : vector<16x16xf32>
    %170 = math.exp %169 : vector<16x16xf32>
    %cst_143 = arith.constant dense<0.000000e+00> : vector<16xf32>
    %171 = vector.multi_reduction <add>, %170, %cst_143 [1] : vector<16x16xf32> to vector<16xf32>
    %172 = vector.shape_cast %171 : vector<16xf32> to vector<16x1xf32>
    %173 = tpu.reciprocal %172 {approx = true} : vector<16x1xf32> -> vector<16x1xf32>
    %174 = vector.broadcast %173 : vector<16x1xf32> to vector<16x16xf32>
    %175 = arith.mulf %170, %174 : vector<16x16xf32>
    %cst_144 = arith.constant dense<0.000000e+00> : vector<16x8xf32>
    %176 = tpu.matmul %175, %163, %cst_144 {dimension_numbers = #tpu.dot_dimension_numbers<[1], [0], [0], [1], [0, 0, 1, 1], [], []>} : vector<16x16xf32>, vector<16x8xf32>, vector<16x8xf32> -> vector<16x8xf32>
    %c0_145 = arith.constant 0 : index
    %c3_146 = arith.constant 3 : index
    %c0_147 = arith.constant 0 : index
    %c0_148 = arith.constant 0 : index
    %177 = vector.load %arg11[%c0_145, %c3_146, %c0_147, %c0_148] : memref<1x4x8x32xf32, #tpu.memory_space<vmem>>, vector<1x1x8x32xf32>
    %178 = vector.shape_cast %177 : vector<1x1x8x32xf32> to vector<8x32xf32>
    %cst_149 = arith.constant dense<0.000000e+00> : vector<16x32xf32>
    %179 = tpu.matmul %176, %178, %cst_149 {dimension_numbers = #tpu.dot_dimension_numbers<[1], [0], [0], [1], [0, 0, 1, 1], [], []>} : vector<16x8xf32>, vector<8x32xf32>, vector<16x32xf32> -> vector<16x32xf32>
    %180 = arith.addf %142, %179 : vector<16x32xf32>
    %c0_150 = arith.constant 0 : index
    %c0_151 = arith.constant 0 : index
    %c0_152 = arith.constant 0 : index
    %181 = vector.load %arg12[%c0_150, %c0_151, %c0_152] : memref<1x1x32xf32, #tpu.memory_space<vmem>>, vector<1x1x32xf32>
    %182 = vector.shape_cast %181 : vector<1x1x32xf32> to vector<1x32xf32>
    %183 = vector.broadcast %182 : vector<1x32xf32> to vector<16x32xf32>
    %184 = arith.addf %180, %183 : vector<16x32xf32>
    %185 = arith.addf %16, %184 : vector<16x32xf32>
    %c0_153 = arith.constant 0 : index
    %c0_154 = arith.constant 0 : index
    %c0_155 = arith.constant 0 : index
    %186 = vector.load %arg13[%c0_153, %c0_154, %c0_155] : memref<1x1x32xf32, #tpu.memory_space<vmem>>, vector<1x1x32xf32>
    %187 = vector.shape_cast %186 : vector<1x1x32xf32> to vector<1x32xf32>
    %c0_156 = arith.constant 0 : index
    %c0_157 = arith.constant 0 : index
    %c0_158 = arith.constant 0 : index
    %188 = vector.load %arg14[%c0_156, %c0_157, %c0_158] : memref<1x1x32xf32, #tpu.memory_space<vmem>>, vector<1x1x32xf32>
    %189 = vector.shape_cast %188 : vector<1x1x32xf32> to vector<1x32xf32>
    %cst_159 = arith.constant dense<0.000000e+00> : vector<16xf32>
    %190 = vector.multi_reduction <add>, %185, %cst_159 [1] : vector<16x32xf32> to vector<16xf32>
    %191 = vector.shape_cast %190 : vector<16xf32> to vector<16x1xf32>
    %cst_160 = arith.constant 3.200000e+01 : f32
    %192 = vector.broadcast %cst_160 : f32 to vector<16x1xf32>
    %193 = arith.divf %191, %192 : vector<16x1xf32>
    %194 = arith.mulf %185, %185 : vector<16x32xf32>
    %cst_161 = arith.constant dense<0.000000e+00> : vector<16xf32>
    %195 = vector.multi_reduction <add>, %194, %cst_161 [1] : vector<16x32xf32> to vector<16xf32>
    %196 = vector.shape_cast %195 : vector<16xf32> to vector<16x1xf32>
    %cst_162 = arith.constant 3.200000e+01 : f32
    %197 = vector.broadcast %cst_162 : f32 to vector<16x1xf32>
    %198 = arith.divf %196, %197 : vector<16x1xf32>
    %199 = arith.mulf %193, %193 : vector<16x1xf32>
    %200 = arith.subf %198, %199 : vector<16x1xf32>
    %201 = vector.broadcast %193 : vector<16x1xf32> to vector<16x32xf32>
    %202 = arith.subf %185, %201 : vector<16x32xf32>
    %cst_163 = arith.constant 9.99999974E-6 : f32
    %203 = vector.broadcast %cst_163 : f32 to vector<16x1xf32>
    %204 = arith.addf %200, %203 : vector<16x1xf32>
    %205 = math.rsqrt %204 : vector<16x1xf32>
    %206 = vector.broadcast %205 : vector<16x1xf32> to vector<16x32xf32>
    %207 = arith.mulf %202, %206 : vector<16x32xf32>
    %208 = vector.broadcast %187 : vector<1x32xf32> to vector<16x32xf32>
    %209 = arith.mulf %207, %208 : vector<16x32xf32>
    %210 = vector.broadcast %189 : vector<1x32xf32> to vector<16x32xf32>
    %211 = arith.addf %209, %210 : vector<16x32xf32>
    %c0_164 = arith.constant 0 : index
    %c0_165 = arith.constant 0 : index
    %c0_166 = arith.constant 0 : index
    %212 = vector.load %arg15[%c0_164, %c0_165, %c0_166] : memref<1x32x64xf32, #tpu.memory_space<vmem>>, vector<1x32x64xf32>
    %213 = vector.shape_cast %212 : vector<1x32x64xf32> to vector<32x64xf32>
    %cst_167 = arith.constant dense<0.000000e+00> : vector<16x64xf32>
    %214 = tpu.matmul %211, %213, %cst_167 {dimension_numbers = #tpu.dot_dimension_numbers<[1], [0], [0], [1], [0, 0, 1, 1], [], []>} : vector<16x32xf32>, vector<32x64xf32>, vector<16x64xf32> -> vector<16x64xf32>
    %c0_168 = arith.constant 0 : index
    %c0_169 = arith.constant 0 : index
    %c0_170 = arith.constant 0 : index
    %215 = vector.load %arg16[%c0_168, %c0_169, %c0_170] : memref<1x1x64xf32, #tpu.memory_space<vmem>>, vector<1x1x64xf32>
    %216 = vector.shape_cast %215 : vector<1x1x64xf32> to vector<1x64xf32>
    %217 = vector.broadcast %216 : vector<1x64xf32> to vector<16x64xf32>
    %218 = arith.addf %214, %217 : vector<16x64xf32>
    %cst_171 = arith.constant 0.000000e+00 : f32
    %219 = vector.broadcast %cst_171 : f32 to vector<16x64xf32>
    %220 = arith.maximumf %218, %219 : vector<16x64xf32>
    %c0_172 = arith.constant 0 : index
    %c0_173 = arith.constant 0 : index
    %c0_174 = arith.constant 0 : index
    %221 = vector.load %arg17[%c0_172, %c0_173, %c0_174] : memref<1x64x32xf32, #tpu.memory_space<vmem>>, vector<1x64x32xf32>
    %222 = vector.shape_cast %221 : vector<1x64x32xf32> to vector<64x32xf32>
    %cst_175 = arith.constant dense<0.000000e+00> : vector<16x32xf32>
    %223 = tpu.matmul %220, %222, %cst_175 {dimension_numbers = #tpu.dot_dimension_numbers<[1], [0], [0], [1], [0, 0, 1, 1], [], []>} : vector<16x64xf32>, vector<64x32xf32>, vector<16x32xf32> -> vector<16x32xf32>
    %c0_176 = arith.constant 0 : index
    %c0_177 = arith.constant 0 : index
    %c0_178 = arith.constant 0 : index
    %224 = vector.load %arg18[%c0_176, %c0_177, %c0_178] : memref<1x1x32xf32, #tpu.memory_space<vmem>>, vector<1x1x32xf32>
    %225 = vector.shape_cast %224 : vector<1x1x32xf32> to vector<1x32xf32>
    %226 = vector.broadcast %225 : vector<1x32xf32> to vector<16x32xf32>
    %227 = arith.addf %223, %226 : vector<16x32xf32>
    %228 = arith.addf %211, %227 : vector<16x32xf32>
    %c0_179 = arith.constant 0 : index
    %c0_180 = arith.constant 0 : index
    %c0_181 = arith.constant 0 : index
    %229 = vector.load %arg19[%c0_179, %c0_180, %c0_181] : memref<1x1x32xf32, #tpu.memory_space<vmem>>, vector<1x1x32xf32>
    %230 = vector.shape_cast %229 : vector<1x1x32xf32> to vector<1x32xf32>
    %c0_182 = arith.constant 0 : index
    %c0_183 = arith.constant 0 : index
    %c0_184 = arith.constant 0 : index
    %231 = vector.load %arg20[%c0_182, %c0_183, %c0_184] : memref<1x1x32xf32, #tpu.memory_space<vmem>>, vector<1x1x32xf32>
    %232 = vector.shape_cast %231 : vector<1x1x32xf32> to vector<1x32xf32>
    %cst_185 = arith.constant dense<0.000000e+00> : vector<16xf32>
    %233 = vector.multi_reduction <add>, %228, %cst_185 [1] : vector<16x32xf32> to vector<16xf32>
    %234 = vector.shape_cast %233 : vector<16xf32> to vector<16x1xf32>
    %cst_186 = arith.constant 3.200000e+01 : f32
    %235 = vector.broadcast %cst_186 : f32 to vector<16x1xf32>
    %236 = arith.divf %234, %235 : vector<16x1xf32>
    %237 = arith.mulf %228, %228 : vector<16x32xf32>
    %cst_187 = arith.constant dense<0.000000e+00> : vector<16xf32>
    %238 = vector.multi_reduction <add>, %237, %cst_187 [1] : vector<16x32xf32> to vector<16xf32>
    %239 = vector.shape_cast %238 : vector<16xf32> to vector<16x1xf32>
    %cst_188 = arith.constant 3.200000e+01 : f32
    %240 = vector.broadcast %cst_188 : f32 to vector<16x1xf32>
    %241 = arith.divf %239, %240 : vector<16x1xf32>
    %242 = arith.mulf %236, %236 : vector<16x1xf32>
    %243 = arith.subf %241, %242 : vector<16x1xf32>
    %244 = vector.broadcast %236 : vector<16x1xf32> to vector<16x32xf32>
    %245 = arith.subf %228, %244 : vector<16x32xf32>
    %cst_189 = arith.constant 9.99999974E-6 : f32
    %246 = vector.broadcast %cst_189 : f32 to vector<16x1xf32>
    %247 = arith.addf %243, %246 : vector<16x1xf32>
    %248 = math.rsqrt %247 : vector<16x1xf32>
    %249 = vector.broadcast %248 : vector<16x1xf32> to vector<16x32xf32>
    %250 = arith.mulf %245, %249 : vector<16x32xf32>
    %251 = vector.broadcast %230 : vector<1x32xf32> to vector<16x32xf32>
    %252 = arith.mulf %250, %251 : vector<16x32xf32>
    %253 = vector.broadcast %232 : vector<1x32xf32> to vector<16x32xf32>
    %254 = arith.addf %252, %253 : vector<16x32xf32>
    %c0_190 = arith.constant 0 : index
    %c0_191 = arith.constant 0 : index
    %255 = vector.load %arg27[%c0_190, %c0_191] : memref<16x32xf32, #tpu.memory_space<vmem>>, vector<16x32xf32>
    tpu.vector_store %arg27[%c0_190, %c0_191], %254 {strides = array<i32>} : memref<16x32xf32, #tpu.memory_space<vmem>>, vector<16x32xf32>,
    %c1_i32_192 = arith.constant 1 : i32
    %256 = arith.cmpi eq, %arg0, %c1_i32_192 : i32
    %257 = arith.extui %256 : i1 to i32
    %c0_i32_193 = arith.constant 0 : i32
    %258 = arith.cmpi ne, %257, %c0_i32_193 : i32
    scf.if %258 {
      %c0_194 = arith.constant 0 : index
      %c0_195 = arith.constant 0 : index
      %259 = vector.load %arg27[%c0_194, %c0_195] : memref<16x32xf32, #tpu.memory_space<vmem>>, vector<16x32xf32>
      %260 = tpu.iota {dimensions = array<i32: 1>} : vector<2x16xi32>
      %261 = tpu.iota {dimensions = array<i32: 0>} : vector<2x16xi32>
      %c8_i32_196 = arith.constant 8 : i32
      %262 = vector.broadcast %c8_i32_196 : i32 to vector<2x16xi32>
      %263 = arith.muli %261, %262 : vector<2x16xi32>
      %264 = arith.cmpi eq, %260, %263 : vector<2x16xi32>
      %265 = arith.extui %264 : vector<2x16xi1> to vector<2x16xi32>
      %266 = arith.sitofp %265 : vector<2x16xi32> to vector<2x16xf32>
      %cst_197 = arith.constant dense<0.000000e+00> : vector<2x32xf32>
      %267 = tpu.matmul %266, %259, %cst_197 {dimension_numbers = #tpu.dot_dimension_numbers<[1], [0], [0], [1], [0, 0, 1, 1], [], []>} : vector<2x16xf32>, vector<16x32xf32>, vector<2x32xf32> -> vector<2x32xf32>
      %268 = vector.extract_strided_slice %267 {offsets = [0, 0], sizes = [2, 16], strides = [1, 1]} : vector<2x32xf32> to vector<2x16xf32>
      %269 = vector.extract_strided_slice %267 {offsets = [0, 16], sizes = [2, 16], strides = [1, 1]} : vector<2x32xf32> to vector<2x16xf32>
      %cst_198 = arith.constant 0.000000e+00 : f32
      %270 = vector.broadcast %cst_198 : f32 to vector<2x16xf32>
      %271 = arith.maximumf %269, %270 : vector<2x16xf32>
      %272 = math.absf %269 : vector<2x16xf32>
      %cst_199 = arith.constant 0.000000e+00 : f32
      %273 = vector.broadcast %cst_199 : f32 to vector<2x16xf32>
      %274 = arith.subf %273, %272 : vector<2x16xf32>
      %275 = math.exp %274 : vector<2x16xf32>
      %cst_200 = arith.constant 1.000000e+00 : f32
      %276 = vector.broadcast %cst_200 : f32 to vector<2x16xf32>
      %277 = arith.addf %276, %275 : vector<2x16xf32>
      %278 = math.log %277 : vector<2x16xf32>
      %279 = arith.addf %271, %278 : vector<2x16xf32>
      %280 = arith.addf %268, %279 : vector<2x16xf32>
      %281 = tpu.iota {dimensions = array<i32: 1>} : vector<2x10xi32>
      %c0_201 = arith.constant 0 : index
      %c0_202 = arith.constant 0 : index
      %282 = vector.load %arg23[%c0_201, %c0_202] : memref<2x1xi32, #tpu.memory_space<vmem>>, vector<2x1xi32>
      %283 = vector.broadcast %282 : vector<2x1xi32> to vector<2x10xi32>
      %284 = arith.cmpi eq, %283, %281 : vector<2x10xi32>
      %285 = arith.extui %284 : vector<2x10xi1> to vector<2x10xi32>
      %286 = arith.sitofp %285 : vector<2x10xi32> to vector<2x10xf32>
      %c0_203 = arith.constant 0 : index
      %c0_204 = arith.constant 0 : index
      %287 = vector.load %arg21[%c0_203, %c0_204] : memref<10x16xf32, #tpu.memory_space<vmem>>, vector<10x16xf32>
      %cst_205 = arith.constant dense<0.000000e+00> : vector<2x16xf32>
      %288 = tpu.matmul %286, %287, %cst_205 {dimension_numbers = #tpu.dot_dimension_numbers<[1], [0], [0], [1], [0, 0, 1, 1], [], []>} : vector<2x10xf32>, vector<10x16xf32>, vector<2x16xf32> -> vector<2x16xf32>
      %c0_206 = arith.constant 0 : index
      %c0_207 = arith.constant 0 : index
      %289 = vector.load %arg22[%c0_206, %c0_207] : memref<10x16xf32, #tpu.memory_space<vmem>>, vector<10x16xf32>
      %cst_208 = arith.constant dense<0.000000e+00> : vector<2x16xf32>
      %290 = tpu.matmul %286, %289, %cst_208 {dimension_numbers = #tpu.dot_dimension_numbers<[1], [0], [0], [1], [0, 0, 1, 1], [], []>} : vector<2x10xf32>, vector<10x16xf32>, vector<2x16xf32> -> vector<2x16xf32>
      %cst_209 = arith.constant 0.000000e+00 : f32
      %291 = vector.broadcast %cst_209 : f32 to vector<2x16xf32>
      %292 = arith.maximumf %290, %291 : vector<2x16xf32>
      %293 = math.absf %290 : vector<2x16xf32>
      %cst_210 = arith.constant 0.000000e+00 : f32
      %294 = vector.broadcast %cst_210 : f32 to vector<2x16xf32>
      %295 = arith.subf %294, %293 : vector<2x16xf32>
      %296 = math.exp %295 : vector<2x16xf32>
      %cst_211 = arith.constant 1.000000e+00 : f32
      %297 = vector.broadcast %cst_211 : f32 to vector<2x16xf32>
      %298 = arith.addf %297, %296 : vector<2x16xf32>
      %299 = math.log %298 : vector<2x16xf32>
      %300 = arith.addf %292, %299 : vector<2x16xf32>
      %301 = arith.addf %288, %300 : vector<2x16xf32>
      %302 = arith.maximumf %268, %288 : vector<2x16xf32>
      %303 = arith.minimumf %280, %301 : vector<2x16xf32>
      %304 = arith.subf %303, %302 : vector<2x16xf32>
      %cst_212 = arith.constant 0.000000e+00 : f32
      %305 = vector.broadcast %cst_212 : f32 to vector<2x16xf32>
      %306 = arith.maximumf %304, %305 : vector<2x16xf32>
      %307 = math.absf %304 : vector<2x16xf32>
      %cst_213 = arith.constant 0.000000e+00 : f32
      %308 = vector.broadcast %cst_213 : f32 to vector<2x16xf32>
      %309 = arith.subf %308, %307 : vector<2x16xf32>
      %310 = math.exp %309 : vector<2x16xf32>
      %cst_214 = arith.constant 1.000000e+00 : f32
      %311 = vector.broadcast %cst_214 : f32 to vector<2x16xf32>
      %312 = arith.addf %311, %310 : vector<2x16xf32>
      %313 = math.log %312 : vector<2x16xf32>
      %314 = arith.addf %306, %313 : vector<2x16xf32>
      %cst_215 = arith.constant 1.000000e-10 : f32
      %315 = vector.broadcast %cst_215 : f32 to vector<2x16xf32>
      %316 = arith.addf %314, %315 : vector<2x16xf32>
      %317 = math.log %316 : vector<2x16xf32>
      %cst_216 = arith.constant dense<0.000000e+00> : vector<2xf32>
      %318 = vector.multi_reduction <add>, %317, %cst_216 [1] : vector<2x16xf32> to vector<2xf32>
      %319 = vector.shape_cast %318 : vector<2xf32> to vector<2x1xf32>
      %320 = arith.subf %301, %288 : vector<2x16xf32>
      %cst_217 = arith.constant 0.000000e+00 : f32
      %321 = vector.broadcast %cst_217 : f32 to vector<2x16xf32>
      %322 = arith.maximumf %320, %321 : vector<2x16xf32>
      %323 = math.absf %320 : vector<2x16xf32>
      %cst_218 = arith.constant 0.000000e+00 : f32
      %324 = vector.broadcast %cst_218 : f32 to vector<2x16xf32>
      %325 = arith.subf %324, %323 : vector<2x16xf32>
      %326 = math.exp %325 : vector<2x16xf32>
      %cst_219 = arith.constant 1.000000e+00 : f32
      %327 = vector.broadcast %cst_219 : f32 to vector<2x16xf32>
      %328 = arith.addf %327, %326 : vector<2x16xf32>
      %329 = math.log %328 : vector<2x16xf32>
      %330 = arith.addf %322, %329 : vector<2x16xf32>
      %cst_220 = arith.constant 1.000000e-10 : f32
      %331 = vector.broadcast %cst_220 : f32 to vector<2x16xf32>
      %332 = arith.addf %330, %331 : vector<2x16xf32>
      %333 = math.log %332 : vector<2x16xf32>
      %cst_221 = arith.constant dense<0.000000e+00> : vector<2xf32>
      %334 = vector.multi_reduction <add>, %333, %cst_221 [1] : vector<2x16xf32> to vector<2xf32>
      %335 = vector.shape_cast %334 : vector<2xf32> to vector<2x1xf32>
      %336 = arith.subf %319, %335 : vector<2x1xf32>
      %337 = math.exp %336 : vector<2x1xf32>
      %cst_222 = arith.constant 0.000000e+00 : f32
      %cst_223 = arith.constant 1.000000e+00 : f32
      %338 = vector.broadcast %cst_222 : f32 to vector<2x1xf32>
      %339 = arith.maximumf %338, %337 : vector<2x1xf32>
      %340 = vector.broadcast %cst_223 : f32 to vector<2x1xf32>
      %341 = arith.minimumf %340, %339 : vector<2x1xf32>
      %c0_224 = arith.constant 0 : index
      %c0_225 = arith.constant 0 : index
      %342 = vector.load %arg25[%c0_224, %c0_225] : memref<2x1xf32, #tpu.memory_space<vmem>>, vector<2x1xf32>
      tpu.vector_store %arg25[%c0_224, %c0_225], %341 {strides = array<i32>} : memref<2x1xf32, #tpu.memory_space<vmem>>, vector<2x1xf32>,
      %c0_226 = arith.constant 0 : index
      %c0_227 = arith.constant 0 : index
      %343 = vector.load %arg24[%c0_226, %c0_227] : memref<2x1xi32, #tpu.memory_space<vmem>>, vector<2x1xi32>
      %344 = vector.broadcast %343 : vector<2x1xi32> to vector<2x10xi32>
      %345 = arith.cmpi eq, %344, %281 : vector<2x10xi32>
      %346 = arith.extui %345 : vector<2x10xi1> to vector<2x10xi32>
      %347 = arith.sitofp %346 : vector<2x10xi32> to vector<2x10xf32>
      %c0_228 = arith.constant 0 : index
      %c0_229 = arith.constant 0 : index
      %348 = vector.load %arg21[%c0_228, %c0_229] : memref<10x16xf32, #tpu.memory_space<vmem>>, vector<10x16xf32>
      %cst_230 = arith.constant dense<0.000000e+00> : vector<2x16xf32>
      %349 = tpu.matmul %347, %348, %cst_230 {dimension_numbers = #tpu.dot_dimension_numbers<[1], [0], [0], [1], [0, 0, 1, 1], [], []>} : vector<2x10xf32>, vector<10x16xf32>, vector<2x16xf32> -> vector<2x16xf32>
      %c0_231 = arith.constant 0 : index
      %c0_232 = arith.constant 0 : index
      %350 = vector.load %arg22[%c0_231, %c0_232] : memref<10x16xf32, #tpu.memory_space<vmem>>, vector<10x16xf32>
      %cst_233 = arith.constant dense<0.000000e+00> : vector<2x16xf32>
      %351 = tpu.matmul %347, %350, %cst_233 {dimension_numbers = #tpu.dot_dimension_numbers<[1], [0], [0], [1], [0, 0, 1, 1], [], []>} : vector<2x10xf32>, vector<10x16xf32>, vector<2x16xf32> -> vector<2x16xf32>
      %cst_234 = arith.constant 0.000000e+00 : f32
      %352 = vector.broadcast %cst_234 : f32 to vector<2x16xf32>
      %353 = arith.maximumf %351, %352 : vector<2x16xf32>
      %354 = math.absf %351 : vector<2x16xf32>
      %cst_235 = arith.constant 0.000000e+00 : f32
      %355 = vector.broadcast %cst_235 : f32 to vector<2x16xf32>
      %356 = arith.subf %355, %354 : vector<2x16xf32>
      %357 = math.exp %356 : vector<2x16xf32>
      %cst_236 = arith.constant 1.000000e+00 : f32
      %358 = vector.broadcast %cst_236 : f32 to vector<2x16xf32>
      %359 = arith.addf %358, %357 : vector<2x16xf32>
      %360 = math.log %359 : vector<2x16xf32>
      %361 = arith.addf %353, %360 : vector<2x16xf32>
      %362 = arith.addf %349, %361 : vector<2x16xf32>
      %363 = arith.maximumf %268, %349 : vector<2x16xf32>
      %364 = arith.minimumf %280, %362 : vector<2x16xf32>
      %365 = arith.subf %364, %363 : vector<2x16xf32>
      %cst_237 = arith.constant 0.000000e+00 : f32
      %366 = vector.broadcast %cst_237 : f32 to vector<2x16xf32>
      %367 = arith.maximumf %365, %366 : vector<2x16xf32>
      %368 = math.absf %365 : vector<2x16xf32>
      %cst_238 = arith.constant 0.000000e+00 : f32
      %369 = vector.broadcast %cst_238 : f32 to vector<2x16xf32>
      %370 = arith.subf %369, %368 : vector<2x16xf32>
      %371 = math.exp %370 : vector<2x16xf32>
      %cst_239 = arith.constant 1.000000e+00 : f32
      %372 = vector.broadcast %cst_239 : f32 to vector<2x16xf32>
      %373 = arith.addf %372, %371 : vector<2x16xf32>
      %374 = math.log %373 : vector<2x16xf32>
      %375 = arith.addf %367, %374 : vector<2x16xf32>
      %cst_240 = arith.constant 1.000000e-10 : f32
      %376 = vector.broadcast %cst_240 : f32 to vector<2x16xf32>
      %377 = arith.addf %375, %376 : vector<2x16xf32>
      %378 = math.log %377 : vector<2x16xf32>
      %cst_241 = arith.constant dense<0.000000e+00> : vector<2xf32>
      %379 = vector.multi_reduction <add>, %378, %cst_241 [1] : vector<2x16xf32> to vector<2xf32>
      %380 = vector.shape_cast %379 : vector<2xf32> to vector<2x1xf32>
      %381 = arith.subf %362, %349 : vector<2x16xf32>
      %cst_242 = arith.constant 0.000000e+00 : f32
      %382 = vector.broadcast %cst_242 : f32 to vector<2x16xf32>
      %383 = arith.maximumf %381, %382 : vector<2x16xf32>
      %384 = math.absf %381 : vector<2x16xf32>
      %cst_243 = arith.constant 0.000000e+00 : f32
      %385 = vector.broadcast %cst_243 : f32 to vector<2x16xf32>
      %386 = arith.subf %385, %384 : vector<2x16xf32>
      %387 = math.exp %386 : vector<2x16xf32>
      %cst_244 = arith.constant 1.000000e+00 : f32
      %388 = vector.broadcast %cst_244 : f32 to vector<2x16xf32>
      %389 = arith.addf %388, %387 : vector<2x16xf32>
      %390 = math.log %389 : vector<2x16xf32>
      %391 = arith.addf %383, %390 : vector<2x16xf32>
      %cst_245 = arith.constant 1.000000e-10 : f32
      %392 = vector.broadcast %cst_245 : f32 to vector<2x16xf32>
      %393 = arith.addf %391, %392 : vector<2x16xf32>
      %394 = math.log %393 : vector<2x16xf32>
      %cst_246 = arith.constant dense<0.000000e+00> : vector<2xf32>
      %395 = vector.multi_reduction <add>, %394, %cst_246 [1] : vector<2x16xf32> to vector<2xf32>
      %396 = vector.shape_cast %395 : vector<2xf32> to vector<2x1xf32>
      %397 = arith.subf %380, %396 : vector<2x1xf32>
      %398 = math.exp %397 : vector<2x1xf32>
      %cst_247 = arith.constant 0.000000e+00 : f32
      %cst_248 = arith.constant 1.000000e+00 : f32
      %399 = vector.broadcast %cst_247 : f32 to vector<2x1xf32>
      %400 = arith.maximumf %399, %398 : vector<2x1xf32>
      %401 = vector.broadcast %cst_248 : f32 to vector<2x1xf32>
      %402 = arith.minimumf %401, %400 : vector<2x1xf32>
      %c0_249 = arith.constant 0 : index
      %c0_250 = arith.constant 0 : index
      %403 = vector.load %arg26[%c0_249, %c0_250] : memref<2x1xf32, #tpu.memory_space<vmem>>, vector<2x1xf32>
      tpu.vector_store %arg26[%c0_249, %c0_250], %402 {strides = array<i32>} : memref<2x1xf32, #tpu.memory_space<vmem>>, vector<2x1xf32>,
    } else {
    }
    return
  }
  func.func @transform_0(%arg0: i32) -> (i32, i32) {
    %c0_i32 = arith.constant 0 : i32
    %c0_i32_0 = arith.constant 0 : i32
    %c0_i32_1 = arith.constant 0 : i32
    return %c0_i32, %c0_i32_0 : i32, i32
  }
  func.func @transform_1(%arg0: i32) -> (i32, i32) {
    %c0_i32 = arith.constant 0 : i32
    %c0_i32_0 = arith.constant 0 : i32
    %c0_i32_1 = arith.constant 0 : i32
    return %c0_i32, %c0_i32_0 : i32, i32
  }
  func.func @transform_2(%arg0: i32) -> (i32, i32) {
    %c0_i32 = arith.constant 0 : i32
    %c0_i32_0 = arith.constant 0 : i32
    %c0_i32_1 = arith.constant 0 : i32
    return %c0_i32, %c0_i32_0 : i32, i32
  }
  func.func @transform_3(%arg0: i32) -> (i32, i32) {
    %c0_i32 = arith.constant 0 : i32
    %c0_i32_0 = arith.constant 0 : i32
    %c0_i32_1 = arith.constant 0 : i32
    return %c0_i32, %c0_i32_0 : i32, i32
  }
  func.func @transform_4(%arg0: i32) -> (i32, i32, i32, i32) {
    %c0_i32 = arith.constant 0 : i32
    %c0_i32_0 = arith.constant 0 : i32
    %c0_i32_1 = arith.constant 0 : i32
    %c0_i32_2 = arith.constant 0 : i32
    return %arg0, %c0_i32, %c0_i32_0, %c0_i32_1 : i32, i32, i32, i32
  }
  func.func @transform_5(%arg0: i32) -> (i32, i32, i32, i32) {
    %c0_i32 = arith.constant 0 : i32
    %c0_i32_0 = arith.constant 0 : i32
    %c0_i32_1 = arith.constant 0 : i32
    %c0_i32_2 = arith.constant 0 : i32
    return %arg0, %c0_i32, %c0_i32_0, %c0_i32_1 : i32, i32, i32, i32
  }
  func.func @transform_6(%arg0: i32) -> (i32, i32, i32, i32) {
    %c0_i32 = arith.constant 0 : i32
    %c0_i32_0 = arith.constant 0 : i32
    %c0_i32_1 = arith.constant 0 : i32
    %c0_i32_2 = arith.constant 0 : i32
    return %arg0, %c0_i32, %c0_i32_0, %c0_i32_1 : i32, i32, i32, i32
  }
  func.func @transform_7(%arg0: i32) -> (i32, i32, i32, i32) {
    %c0_i32 = arith.constant 0 : i32
    %c0_i32_0 = arith.constant 0 : i32
    %c0_i32_1 = arith.constant 0 : i32
    %c0_i32_2 = arith.constant 0 : i32
    return %arg0, %c0_i32, %c0_i32_0, %c0_i32_1 : i32, i32, i32, i32
  }
  func.func @transform_8(%arg0: i32) -> (i32, i32, i32, i32) {
    %c0_i32 = arith.constant 0 : i32
    %c0_i32_0 = arith.constant 0 : i32
    %c0_i32_1 = arith.constant 0 : i32
    %c0_i32_2 = arith.constant 0 : i32
    return %arg0, %c0_i32, %c0_i32_0, %c0_i32_1 : i32, i32, i32, i32
  }
  func.func @transform_9(%arg0: i32) -> (i32, i32, i32, i32) {
    %c0_i32 = arith.constant 0 : i32
    %c0_i32_0 = arith.constant 0 : i32
    %c0_i32_1 = arith.constant 0 : i32
    %c0_i32_2 = arith.constant 0 : i32
    return %arg0, %c0_i32, %c0_i32_0, %c0_i32_1 : i32, i32, i32, i32
  }
  func.func @transform_10(%arg0: i32) -> (i32, i32, i32, i32) {
    %c0_i32 = arith.constant 0 : i32
    %c0_i32_0 = arith.constant 0 : i32
    %c0_i32_1 = arith.constant 0 : i32
    %c0_i32_2 = arith.constant 0 : i32
    return %arg0, %c0_i32, %c0_i32_0, %c0_i32_1 : i32, i32, i32, i32
  }
  func.func @transform_11(%arg0: i32) -> (i32, i32, i32) {
    %c0_i32 = arith.constant 0 : i32
    %c0_i32_0 = arith.constant 0 : i32
    %c0_i32_1 = arith.constant 0 : i32
    return %arg0, %c0_i32, %c0_i32_0 : i32, i32, i32
  }
  func.func @transform_12(%arg0: i32) -> (i32, i32, i32) {
    %c0_i32 = arith.constant 0 : i32
    %c0_i32_0 = arith.constant 0 : i32
    %c0_i32_1 = arith.constant 0 : i32
    return %arg0, %c0_i32, %c0_i32_0 : i32, i32, i32
  }
  func.func @transform_13(%arg0: i32) -> (i32, i32, i32) {
    %c0_i32 = arith.constant 0 : i32
    %c0_i32_0 = arith.constant 0 : i32
    %c0_i32_1 = arith.constant 0 : i32
    return %arg0, %c0_i32, %c0_i32_0 : i32, i32, i32
  }
  func.func @transform_14(%arg0: i32) -> (i32, i32, i32) {
    %c0_i32 = arith.constant 0 : i32
    %c0_i32_0 = arith.constant 0 : i32
    %c0_i32_1 = arith.constant 0 : i32
    return %arg0, %c0_i32, %c0_i32_0 : i32, i32, i32
  }
  func.func @transform_15(%arg0: i32) -> (i32, i32, i32) {
    %c0_i32 = arith.constant 0 : i32
    %c0_i32_0 = arith.constant 0 : i32
    %c0_i32_1 = arith.constant 0 : i32
    return %arg0, %c0_i32, %c0_i32_0 : i32, i32, i32
  }
  func.func @transform_16(%arg0: i32) -> (i32, i32, i32) {
    %c0_i32 = arith.constant 0 : i32
    %c0_i32_0 = arith.constant 0 : i32
    %c0_i32_1 = arith.constant 0 : i32
    return %arg0, %c0_i32, %c0_i32_0 : i32, i32, i32
  }
  func.func @transform_17(%arg0: i32) -> (i32, i32, i32) {
    %c0_i32 = arith.constant 0 : i32
    %c0_i32_0 = arith.constant 0 : i32
    %c0_i32_1 = arith.constant 0 : i32
    return %arg0, %c0_i32, %c0_i32_0 : i32, i32, i32
  }
  func.func @transform_18(%arg0: i32) -> (i32, i32, i32) {
    %c0_i32 = arith.constant 0 : i32
    %c0_i32_0 = arith.constant 0 : i32
    %c0_i32_1 = arith.constant 0 : i32
    return %arg0, %c0_i32, %c0_i32_0 : i32, i32, i32
  }
  func.func @transform_19(%arg0: i32) -> (i32, i32, i32) {
    %c0_i32 = arith.constant 0 : i32
    %c0_i32_0 = arith.constant 0 : i32
    %c0_i32_1 = arith.constant 0 : i32
    return %arg0, %c0_i32, %c0_i32_0 : i32, i32, i32
  }
  func.func @transform_20(%arg0: i32) -> (i32, i32) {
    %c0_i32 = arith.constant 0 : i32
    %c0_i32_0 = arith.constant 0 : i32
    %c0_i32_1 = arith.constant 0 : i32
    return %c0_i32, %c0_i32_0 : i32, i32
  }
  func.func @transform_21(%arg0: i32) -> (i32, i32) {
    %c0_i32 = arith.constant 0 : i32
    %c0_i32_0 = arith.constant 0 : i32
    %c0_i32_1 = arith.constant 0 : i32
    return %c0_i32, %c0_i32_0 : i32, i32
  }
  func.func @transform_22(%arg0: i32) -> (i32, i32) {
    %c0_i32 = arith.constant 0 : i32
    %c0_i32_0 = arith.constant 0 : i32
    %c0_i32_1 = arith.constant 0 : i32
    return %c0_i32, %c0_i32_0 : i32, i32
  }
  func.func @transform_23(%arg0: i32) -> (i32, i32) {
    %c0_i32 = arith.constant 0 : i32
    %c0_i32_0 = arith.constant 0 : i32
    %c0_i32_1 = arith.constant 0 : i32
    return %c0_i32, %c0_i32_0 : i32, i32
  }
  func.func @transform_24(%arg0: i32) -> (i32, i32) {
    %c0_i32 = arith.constant 0 : i32
    %c0_i32_0 = arith.constant 0 : i32
    %c0_i32_1 = arith.constant 0 : i32
    return %c0_i32, %c0_i32_0 : i32, i32
  }
  func.func @transform_25(%arg0: i32) -> (i32, i32) {
    %c0_i32 = arith.constant 0 : i32
    %c0_i32_0 = arith.constant 0 : i32
    %c0_i32_1 = arith.constant 0 : i32
    return %c0_i32, %c0_i32_0 : i32, i32
  }
}

</mosaic_0001>

<bundles_post_ra>
// kernel: token_box_forward.1
= control target key start
LH: loop header
LB: loop body
LE: loop exit
PB: predicated region body
PF: predicated region fallthrough
CT: control target
= control target key end

     0   :  { %s5572_s29 = smov 0   ;;  %s6042_s0 = inlined_call_operand.vmem [shape: s32[16,1], index: 0, kind: input, shape index: {}]   ;;  %s6043_s1 = inlined_call_operand.vmem [shape: s32[1,16], index: 1, kind: input, shape index: {}]   ;;  %s6044_s2 = inlined_call_operand.vmem [shape: f32[2,32], index: 2, kind: input, shape index: {}]   ;;  %s6045_s3 = inlined_call_operand.vmem [shape: f32[40,32], index: 3, kind: input, shape index: {}]   ;;  %s6046_s4 = inlined_call_operand.vmem [shape: f32[2,4,32,8], index: 4, kind: input, shape index: {}]   ;;  %s6047_s5 = inlined_call_operand.vmem [shape: f32[2,4,1,8], index: 5, kind: input, shape index: {}]   ;;  %s6048_s6 = inlined_call_operand.vmem [shape: f32[2,4,32,8], index: 6, kind: input, shape index: {}]   ;;  %s6049_s7 = inlined_call_operand.vmem [shape: f32[2,4,1,8], index: 7, kind: input, shape index: {}]   ;;  %s6050_s8 = inlined_call_operand.vmem [shape: f32[2,4,32,8], index: 8, kind: input, shape index: {}]   ;;  %s6051_s9 = inlined_call_operand.vmem [shape: f32[2,4,1,8], index: 9, kind: input, shape index: {}]   ;;  %s6052_s10 = inlined_call_operand.vmem [shape: f32[2,4,8,32], index: 10, kind: input, shape index: {}]   ;;  %s6053_s11 = inlined_call_operand.vmem [shape: f32[2,1,32], index: 11, kind: input, shape index: {}]   ;;  %s6054_s12 = inlined_call_operand.vmem [shape: f32[2,1,32], index: 12, kind: input, shape index: {}]   ;;  %s6055_s13 = inlined_call_operand.vmem [shape: f32[2,1,32], index: 13, kind: input, shape index: {}]   ;;  %s6056_s14 = inlined_call_operand.vmem [shape: f32[2,32,64], index: 14, kind: input, shape index: {}]   ;;  %s6057_s15 = inlined_call_operand.vmem [shape: f32[2,1,64], index: 15, kind: input, shape index: {}]   ;;  %s6058_s16 = inlined_call_operand.vmem [shape: f32[2,64,32], index: 16, kind: input, shape index: {}]   ;;  %s6059_s17 = inlined_call_operand.vmem [shape: f32[2,1,32], index: 17, kind: input, shape index: {}]   ;;  %s6060_s18 = inlined_call_operand.vmem [shape: f32[2,1,32], index: 18, kind: input, shape index: {}]   ;;  %s6061_s19 = inlined_call_operand.vmem [shape: f32[2,1,32], index: 19, kind: input, shape index: {}]   ;;  %s6062_s20 = inlined_call_operand.vmem [shape: f32[10,16], index: 20, kind: input, shape index: {}]   ;;  %s6063_s21 = inlined_call_operand.vmem [shape: f32[10,16], index: 21, kind: input, shape index: {}]   ;;  %s6064_s22 = inlined_call_operand.vmem [shape: s32[2,1], index: 22, kind: input, shape index: {}]   ;;  %s6065_s23 = inlined_call_operand.vmem [shape: s32[2,1], index: 23, kind: input, shape index: {}]   ;;  %s6066_s24 = inlined_call_operand.vmem [shape: f32[2,1], index: 24, kind: output, shape index: {0}]   ;;  %s6067_s25 = inlined_call_operand.vmem [shape: f32[2,1], index: 25, kind: output, shape index: {1}]  }
   0x1   :  { %6073 = sst [smem:[#allocation4_spill]] %s6042_s0 }
   0x2   :  { %6074 = sst [smem:[#allocation5_spill]] %s6043_s1 }
   0x3   :  { %6075 = sst [smem:[#allocation6_spill]] %s6044_s2 }
   0x4   :  { %6076 = sst [smem:[#allocation7_spill]] %s6045_s3 }
   0x5   :  { %6077 = sst [smem:[#allocation8_spill]] %s6046_s4 }
   0x6   :  { %6078 = sst [smem:[#allocation9_spill]] %s6047_s5 }
   0x7   :  { %6079 = sst [smem:[#allocation10_spill]] %s6048_s6 }
   0x8   :  { %6080 = sst [smem:[#allocation11_spill]] %s6049_s7 }
   0x9   :  { %6081 = sst [smem:[#allocation12_spill]] %s6050_s8 }
   0xa   :  { %6082 = sst [smem:[#allocation13_spill]] %s6051_s9 }
   0xb   :  { %6083 = sst [smem:[#allocation14_spill]] %s6052_s10 }
   0xc   :  { %6084 = sst [smem:[#allocation15_spill]] %s6054_s12 }
   0xd   :  { %6085 = sst [smem:[#allocation16_spill]] %s6055_s13 }
   0xe   :  { %6086 = sst [smem:[#allocation17_spill]] %s6056_s14 }
   0xf   :  { %6087 = sst [smem:[#allocation18_spill]] %s6057_s15 }
  0x10   :  { %6088 = sst [smem:[#allocation19_spill]] %s6058_s16 }
  0x11   :  { %6089 = sst [smem:[#allocation20_spill]] %s6062_s20 }
  0x12   :  { %6090 = sst [smem:[#allocation21_spill]] %s6063_s21 }
  0x13   :  { %6091 = sst [smem:[#allocation22_spill]] %s6064_s22 }
  0x14   :  { %6092 = sst [smem:[#allocation23_spill]] %s6065_s23 }
  0x15   :  { %6093 = sst [smem:[#allocation24_spill]] %s6066_s24 }
  0x16   :  { %6094 = sst [smem:[#allocation25_spill]] %s6067_s25 }
  0x17 LB: > { %6095 = sst [smem:[#allocation3_spill]] %s5429_s29  ;;  %s5578_s2 = sadd.s32 4294967295, %s5429_s29   ;;  %s5429_s29 = sphi %s5572_s29, %s36_s29  }
  0x18   : > { %p4486_p0 = scmp.ge.s32.totalorder %s5429_s29, 1  ;;  %p813_p1 = scmp.lt.s32.totalorder %s5429_s29, 3 }
  0x1a   : > { %p814_p2 = pnand %p4486_p0, %p813_p1 }
  0x1b   : > { %p934_p3 = scmp.lt.s32.totalorder (!%p814_p2), %s5578_s2, 1  ;;  %v997_v0 = vlaneseq (!%p814_p2)  ;;  %s6096_s1 = sld [smem:[#allocation8_spill]] (!%p814_p2)  ;;  %v5431_v9 = vmov (!%p814_p2), 0.0  }
  0x1c   : > { %817 = sbr.rel (%p814_p2) target bundleno = 5690 (0x163a), region = 116  ;;  %s6097_s28 = sld [smem:[#allocation9_spill]] (!%p814_p2) }
  0x1d   : > { %v5586_v1 = vshrl.u32 (!%p814_p2), %v997_v0, 7  ;;  %v5588_v2 = vand.u32 (!%p814_p2), 127, %v997_v0  ;;  %s6098_s29 = sld [smem:[#allocation10_spill]] (!%p814_p2)  ;;  %s6099_s20 = sld [smem:[#allocation11_spill]] (!%p814_p2) }
  0x1e   : > { %s6106_s10 = sld [smem:[#allocation14_spill]] (!%p814_p2)  ;;  %s6109_s14 = sld [smem:[#allocation17_spill]] (!%p814_p2) }
  0x1f   : > { %v999_v3 = vadd.s32 (!%p814_p2), 8, %v5586_v1  ;;  %v1002_v4 = vmul.u32 (!%p814_p2), 8, %v5588_v2  ;;  %v1005_v5 = vadd.s32 (!%p814_p2), 1, %v5588_v2  ;;  %s6111_s16 = sld [smem:[#allocation19_spill]] (!%p814_p2)  ;;  %p4504_p4 = scmp.ne.s32.totalorder (!%p814_p2), %s5578_s2, 0 }
  0x21   : > { %vm5616_vm0 = vcmp.ge.s32.totalorder (!%p814_p2), %v5586_v1, %v1002_v4  ;;  %v1006_v7 = vmul.u32 (!%p814_p2), 8, %v1005_v5  ;;  %vm5630_vm1 = vcmp.ge.s32.totalorder (!%p814_p2), %v999_v3, %v1002_v4 }
  0x23   : > { %s5584_s6 = scalar_select %p934_p3, %s5578_s2, 1  ;;  %vm1007_vm2 = vcmp.lt.s32.totalorder %v5586_v1, %v1006_v7  ;;  %vm1008_vm3 = vcmp.lt.s32.totalorder %v999_v3, %v1006_v7 }
  0x24   : > { %vm1009_vm4 = vmand %vm5616_vm0, %vm1007_vm2  ;;  %s6114_s15 = sld [smem:[#allocation7_spill]] (!%p4504_p4)  ;;  %v5432_v14 = vmov (!%p4504_p4), 0   ;;  %vm1128_vm6 = vcmask (!%p4504_p4), 1041408   ;;  %vm1121_vm7 = vcmask (!%p4504_p4), 15360   ;;  %vm1038_vm8 = vcmask (!%p4504_p4), 326656  }
  0x25   : > { %s4658_s30 = sshll.u32 %s5584_s6, 7  ;;  %s4489_s7 = sshll.u32 %s5584_s6, 2  ;;  %vm1010_vm5 = vmand %vm5630_vm1, %vm1008_vm3  ;;  %v5662_v10 = vsel %vm1009_vm4, 1.0, %v5431_v9  ;;  %5341 = vset.pattern.permute.xlu0 (!%p4504_p4), %v5432_v14  ;;  %v5433_v24 = vmov (!%p4504_p4), 0.0   ;;  %vm1211_vm11 = vcmask (!%p4504_p4), 261120  }
  0x26   : > { %s5598_s8 = scalar_lea.vmem %s6096_s1, %s4658_s30  ;;  %s5603_s9 = scalar_lea.vmem %s6097_s28, %s4489_s7  ;;  %v5669_v11 = vsel %vm1010_vm5, 1.0, %v5431_v9  ;;  %4840 = vmatprep.mubr.msk.f32.mxu1 (!%p4504_p4), %vm1121_vm7, %v5662_v10 }
  0x27   : > { %s5608_s25 = scalar_lea.vmem %s6098_s29, %s4658_s30  ;;  %s5613_s21 = scalar_lea.vmem %s6099_s20, %s4489_s7 }
  0x28   : > { %s6102_s1 = sld [smem:[#allocation12_spill]]  ;;  %s6103_s28 = sld [smem:[#allocation13_spill]] }
  0x29   : > { %s4661_s20 = sshll.u32 %s5584_s6, 5  ;;  %s990_s24 = scalar_lea.vmem %s6059_s17, %s5584_s6 }
  0x2a   : > { %s5658_s22 = scalar_lea.vmem %s6109_s14, %s4661_s20  ;;  %s993_s14 = scalar_lea.vmem %s6060_s18, %s5584_s6  ;;  %v1033_v13 = vld [vmem:[%s6114_s15] sm:$0xff] (!%p4504_p4)  ;;  %v1034_v15 = vld [vmem:[%s6114_s15 + $0x8] sm:$0xff] (!%p4504_p4)  ;;  %v1035_v16 = vld [vmem:[%s6114_s15 + $0x10] sm:$0xff] (!%p4504_p4) }
  0x2b   : > { %1018 = sbr.rel (%p4504_p4) target bundleno = 402 (0x192), region = 120  ;;  %s6112_s29 = sld [smem:[#allocation4_spill]] (!%p4504_p4)  ;;  %v1036_v17 = vld [vmem:[%s6114_s15 + $0x18] sm:$0xff] (!%p4504_p4)  ;;  %v5123_v18 = vpack.c.bf16 (!%p4504_p4), %v1034_v15, %v1033_v13  ;;  %v1037_v22 = vld [vmem:[%s6114_s15 + $0x20] sm:$0xff] (!%p4504_p4) }
  0x2c   : > { %v5127_v19 = vpack.c.bf16 (!%p4504_p4), %v1036_v17, %v1035_v16 }
  0x2d   : > { %5124 = vmatprep.subr.bf16.mxu0 (!%p4504_p4), %v5123_v18 }
  0x2e   : > { %s5623_s27 = scalar_lea.vmem %s6102_s1, %s4658_s30  ;;  %s5628_s5 = scalar_lea.vmem %s6103_s28, %s4489_s7  ;;  %5126 = vmatpush3.bf16.msra.mxu0 (!%p4504_p4), %v5123_v18 }
  0x2f   : > { %s5643_s7 = scalar_lea.vmem %s6106_s10, %s4661_s20  ;;  %s4663_s1 = sshll.u32 %s5584_s6, 6  ;;  %5128 = vmatprep.subr.bf16.mxu0 (!%p4504_p4), %v5127_v19 }
  0x30   : > { %s5674_s23 = scalar_lea.vmem %s6111_s16, %s4663_s1  ;;  %s996_s30 = scalar_lea.vmem %s6061_s19, %s5584_s6 }
  0x31   : > { %s6113_s28 = smov (!%p4504_p4), %s6112_s29  ;;  %v1019_v12 = vld [vmem:[%s6112_s29] sm:$0xff] (!%p4504_p4)  ;;  %s6115_s1 = sld [smem:[#allocation6_spill]] (!%p4504_p4) }
  0x32   : > { %1022 = vperm.xlu0 %5341, %v1019_v12   ;;  %v1020_v20 = vld [vmem:[%s6113_s28 + $0x8] sm:$0xff]  ;;  %5130 = vmatpush3.bf16.msra.mxu0 %v5127_v19 }
  0x33   : > { %4833 = vmatprep.subr.mxu0 %v1037_v22 }
  0x36   : > { %1025 = vperm.xlu0 %5341, %v1020_v20   ;;  %4834 = vmatpush3.msra.mxu0 %v1037_v22 }
  0x37   : > { %v1120_v21 = vld [vmem:[%s6115_s1] sm:$0x3] }
  0x38   : > { %4838 = vmatprep.subr.msk.mxu1 %vm1128_vm6, %v1120_v21 }
  0x39   : > { %4839 = vmatpush3.msk.msra.mxu1 %vm1128_vm6, %v1120_v21 }
  0x3a   : > { %4841 = vmatmul.mubr.msk.f32.vlgmr.msra.gmra.mrb[0].mxu1 %vm1121_vm7, %v5669_v11 }
  0xb1   : > { %v1023_v23 = vpop.permute.xlu0 %1022 }
  0xb2   : > { %vm1027_vm9 = vcmp.eq.s32.totalorder %v1023_v23, %v5588_v2 }
  0xb3   : > { %v4505_v25 = vsel %vm1027_vm9, 1.0, %v5433_v24 }
  0xb4   : > { %4835 = vmatprep.mubr.msk.f32.mxu0 %vm1038_vm8, %v4505_v25 }
  0xb5   : > { %v1026_v26 = vpop.permute.xlu0 %1025 }
  0xb6   : > { %vm1028_vm10 = vcmp.eq.s32.totalorder %v1026_v26, %v5588_v2 }
  0xb7   : > { %v4506_v27 = vsel %vm1028_vm10, 1.0, %v5433_v24 }
  0xb8   : > { %4836 = vmatmul.mubr.msk.f32.vlgmr.msra.gmra.mrb[0].mxu0 %vm1038_vm8, %v4506_v27 }
 0x10d   : > { %v4842_v28 = vpop.f32.mrb[0].mxu1 }
 0x10e   : > { %v1198_v29 = vpop.f32.mrb[1].mxu1 }
 0x18b   : > { %v4837_v30 = vpop.f32.mrb[0].mxu0 }
 0x18c   : > { %v1208_v31 = vmul.f32 5.656854, %v4837_v30  ;;  %v1111_v32 = vpop.f32.mrb[1].mxu0 }
 0x18d   : > { %v1207_v33 = vmul.f32 5.656854, %v1111_v32 }
 0x18e   : > { %v1210_v34 = vadd.f32 %v4842_v28, %v1208_v31 }
 0x18f   : > { %v1209_v35 = vadd.f32 %v1207_v33, %v1198_v29 }
 0x190   : > { %1213 = vst.msk [vmem:[#allocation2 + $0x8] sm:$0xff] %vm1211_vm11, %v1210_v34 }
 0x191   : > { %1212 = vst.msk [vmem:[#allocation2] sm:$0xff] %vm1211_vm11, %v1209_v35 }
 0x192 PF: > { %vm1216_vm12 = vcmask 15360   ;;  %v5131_v36 = vpack.c.bf16 %v5669_v11, %v5662_v10  ;;  %v1405_v37 = vld [vmem:[%s5608_s25] sm:$0xff]  ;;  %v1406_v38 = vld [vmem:[%s5608_s25 + $0x8] sm:$0xff]  ;;  %v1407_v39 = vld [vmem:[%s5608_s25 + $0x10] sm:$0xff]  ;;  %vm1323_vm13 = vcmask 261120   ;;  %vm1577_vm15 = vcmask 64512  }
 0x193   : > { %vm5132_vm14 = vmpackc.low %vm1216_vm12, %vm1216_vm12  ;;  %v5145_v40 = vpack.c.bf16 %v1406_v38, %v1405_v37  ;;  %v1408_v41 = vld [vmem:[%s5608_s25 + $0x18] sm:$0xff]  ;;  %4847 = vmatprep.mubr.msk.f32.mxu1 %vm1216_vm12, %v5662_v10  ;;  %v1312_v44 = vld [vmem:[%s5598_s8] sm:$0xff]  ;;  %s6118_s13 = sld [smem:[#allocation5_spill]]  ;;  %v1305_v10 = vsub.s32 0, %v5586_v1  ;;  %v5435_v15 = vmov -1e+30  }
 0x194   : > { %5133 = vmatprep.subr.msk.bf16.mxu1 %vm5132_vm14, %v5131_v36  ;;  %v5149_v43 = vpack.c.bf16 %v1408_v41, %v1407_v39  ;;  %v1313_v45 = vld [vmem:[%s5598_s8 + $0x8] sm:$0xff]  ;;  %v1314_v47 = vld [vmem:[%s5598_s8 + $0x10] sm:$0xff]  ;;  %v1315_v48 = vld [vmem:[%s5598_s8 + $0x18] sm:$0xff]  ;;  %vm1665_vm7 = vcmask 130048   ;;  %s6122_s26 = sld [smem:[#allocation16_spill]]  ;;  %s6124_s1 = sld [smem:[#allocation18_spill]] }
 0x195   : > { %5146 = vmatprep.subr.bf16.mxu0 %v5145_v40  ;;  %5136 = vmatpush3.bf16.xpose.msk.msra.mxu1 %vm5132_vm14, %v5131_v36  ;;  %v5137_v46 = vpack.c.bf16 %v1313_v45, %v1312_v44  ;;  %v5141_v50 = vpack.c.bf16 %v1315_v48, %v1314_v47  ;;  %v4519_v51 = vld [vmem:[%s5613_s21] ss:$0 sm:$0xff]  ;;  %vm5750_vm0 = vmpackc.low %vm1577_vm15, %vm1577_vm15  ;;  %v1492_v4 = vld [vmem:[%s5623_s27 + $0x8] sm:$0xff]  ;;  %vm3635_vm8 = vcmask 523264   ;;  %p4643_p5 = scmp.ne.s32.totalorder %s5578_s2, 1 }
 0x196   : > { %5148 = vmatpush3.bf16.msra.mxu0 %v5145_v40  ;;  %v4516_v60 = vld [vmem:[%s5603_s9] ss:$0 sm:$0xff]  ;;  %v1493_v5 = vld [vmem:[%s5623_s27 + $0x10] sm:$0xff]  ;;  %v1494_v7 = vld [vmem:[%s5623_s27 + $0x18] sm:$0xff]  ;;  %vm5438_vm9 = vmmov (!%p4643_p5), 0   ;;  %vm3879_vm10 = vcmask (!%p4643_p5), 1041408  }
 0x197   : > { %5150 = vmatprep.subr.bf16.mxu0 %v5149_v43  ;;  %5138 = vmatprep.subr.bf16.mxu1 %v5137_v46  ;;  %v5735_v49 = vld [vmem:[#allocation2 + $0x8] sm:$0xff]  ;;  %v1491_v3 = vld [vmem:[%s5623_s27] sm:$0xff]  ;;  %v5157_v8 = vpack.c.bf16 %v1494_v7, %v1493_v5  ;;  %v4541_v41 = vld [vmem:[%s5608_s25 + $0x30] sm:$0xff]  ;;  %vm3875_vm14 = vcmask (!%p4643_p5), 80896   ;;  %s5441_s4 = smov (!%p4643_p5), 112   ;;  %s6132_s12 = sld [smem:[#allocation24_spill]] (!%p4643_p5) }
 0x198   : > { %v5725_v42 = vld [vmem:[#allocation2] sm:$0xff]  ;;  %v5153_v6 = vpack.c.bf16 %v1492_v4, %v1491_v3  ;;  %v4540_v34 = vld [vmem:[%s5608_s25 + $0x28] sm:$0xff] }
 0x199   : > { %4869 = vmatprep.mubr.msk.f32.mxu0 %vm1323_vm13, %v5725_v42  ;;  %v1298_v9 = vld [vmem:[%s6118_s13] sm:$0x1]  ;;  %v4532_v47 = vld [vmem:[%s5598_s8 + $0x28] sm:$0xff] }
 0x19a   : > { %5152 = vmatpush3.bf16.msra.mxu0 %v5149_v43  ;;  %vm1299_vm1 = vcmp.ne.s32.totalorder %v1298_v9, 32  ;;  %v4539_v33 = vld [vmem:[%s5608_s25 + $0x20] sm:$0xff]  ;;  %v4542_v43 = vld [vmem:[%s5608_s25 + $0x38] sm:$0xff]  ;;  %s6123_s16 = scalar_lea.vmem %s6122_s26, %s5584_s6  ;;  %s6125_s20 = scalar_lea.vmem %s6124_s1, %s5584_s6 }
 0x19b   : > { %v5179_v35 = vpack.c.bf16 %v4540_v34, %v4539_v33  ;;  %v4522_v37 = vld [vmem:[%s5628_s5] ss:$0 sm:$0xff]  ;;  %v5183_v44 = vpack.c.bf16 %v4542_v43, %v4541_v41  ;;  %v4561_v41 = vld [vmem:[%s5643_s7 + $0x8] sm:$0xff]  ;;  %s6129_s26 = sld [smem:[#allocation23_spill]] (!%p4643_p5) }
 0x19c   : > { %4848 = vmatmul.mubr.msk.f32.vlgmr.msra.gmra.mrb[0].mxu1 %vm1216_vm12, %v5669_v11  ;;  %v5434_v11 = vmov 0   ;;  %vm5440_vm12 = vmmov (!%p4643_p5), 1  }
 0x19d   : > { %4870 = vmatmul.mubr.msk.f32.vlgmr.msra.gmra.mrb[0].mxu0 %vm1323_vm13, %v5735_v49  ;;  %5140 = vmatpush3.bf16.msra.mxu1 %v5137_v46  ;;  %v1302_v12 = vsel %vm1299_vm1, 1, %v5434_v11  ;;  %v4531_v46 = vld [vmem:[%s5598_s8 + $0x20] sm:$0xff]  ;;  %vm4053_vm1 = vcmask (!%p4643_p5), 123904  }
 0x19e   : > { %5142 = vmatprep.subr.bf16.mxu1 %v5141_v50  ;;  %4858 = vmatprep.mubr.msk.f32.mxu1 %vm1323_vm13, %v5725_v42  ;;  %v1306_v13 = vrot.slane %v1302_v12, %v1305_v10  ;;  %v5171_v48 = vpack.c.bf16 %v4532_v47, %v4531_v46  ;;  %v4547_v11 = vld [vmem:[%s5623_s27 + $0x20] sm:$0xff]  ;;  %v4548_v12 = vld [vmem:[%s5623_s27 + $0x28] sm:$0xff] }
 0x1a0   : > { %vm1307_vm2 = vcmp.eq.s32.totalorder %v1306_v13, 1  ;;  %v4549_v13 = vld [vmem:[%s5623_s27 + $0x30] sm:$0xff] }
 0x1a1   : > { %5144 = vmatpush3.bf16.msra.mxu1 %v5141_v50 }
 0x1a2   : > { %5154 = vmatprep.subr.bf16.mxu1 %v5153_v6 }
 0x1a4   : > { %4859 = vmatmul.mubr.msk.f32.vlgmr.msra.gmra.mrb[2].mxu1 %vm1323_vm13, %v5735_v49 }
 0x1a5   : > { %4880 = vmatprep.mubr.msk.f32.mxu1 %vm1323_vm13, %v5725_v42  ;;  %5156 = vmatpush3.bf16.msra.mxu1 %v5153_v6  ;;  %v4536_v6 = vld [vmem:[%s5603_s9 + $0x1] ss:$0 sm:$0xff] }
 0x1a6   : > { %5158 = vmatprep.subr.bf16.mxu1 %v5157_v8 }
 0x1a9   : > { %5160 = vmatpush3.bf16.msra.mxu1 %v5157_v8 }
 0x1ac   : > { %4881 = vmatmul.mubr.msk.f32.vlgmr.msra.gmra.mrb[4].mxu1 %vm1323_vm13, %v5735_v49 }
 0x26f   : > { %v4849_v52 = vpop.f32.mrb[0].mxu1 }
 0x270   : > { %v4871_v53 = vpop.f32.mrb[0].mxu0  ;;  %v1289_v54 = vpop.f32.mrb[1].mxu1  ;;  %vm1301_vm4 = vcmp.gt.f32.partialorder %v4849_v52, 0.5 }
 0x271   : > { %v1488_v55 = vadd.f32 %v4871_v53, %v4519_v51  ;;  %v1482_v56 = vpop.f32.mrb[1].mxu0  ;;  %vm1300_vm3 = vcmp.gt.f32.partialorder %v1289_v54, 0.5  ;;  %vm1309_vm6 = vmand %vm1301_vm4, %vm1307_vm2  ;;  %v4533_v54 = vld [vmem:[%s5598_s8 + $0x30] sm:$0xff] }
 0x272   : > { %v1483_v57 = vadd.f32 %v4519_v51, %v1482_v56  ;;  %vm1308_vm5 = vmand %vm1300_vm3, %vm1307_vm2  ;;  %v5776_v19 = vsel %vm1309_vm6, 0.0, %v5435_v15  ;;  %vm4078_vm2 = vcmask (!%p4643_p5), 1024  }
 0x273   : > { %v5773_v16 = vsel %vm1308_vm5, 0.0, %v5435_v15  ;;  %v4550_v15 = vld [vmem:[%s5623_s27 + $0x38] sm:$0xff] }
 0x274   : > { %v5161_v59 = vpack.c.bf16 %v1488_v55, %v1483_v57  ;;  %v4534_v55 = vld [vmem:[%s5598_s8 + $0x38] sm:$0xff] }
 0x276   : > { %5163 = vmatprep.subr.msk.bf16.mxu0 %vm5750_vm0, %v5161_v59 }
 0x277   : > { %5166 = vmatpush3.bf16.xpose.msk.msra.mxu0 %vm5750_vm0, %v5161_v59  ;;  %v4860_v61 = vpop.f32.mrb[2].mxu1  ;;  %v5175_v59 = vpack.c.bf16 %v4534_v55, %v4533_v54  ;;  %v4568_v54 = vld [vmem:[%s5598_s8 + $0x50] sm:$0xff]  ;;  %v4569_v55 = vld [vmem:[%s5598_s8 + $0x58] sm:$0xff] }
 0x278   : > { %v1396_v62 = vpop.f32.mrb[3].mxu1  ;;  %v1402_v0 = vadd.f32 %v4860_v61, %v4516_v60  ;;  %5180 = vmatprep.subr.bf16.mxu0 %v5179_v35 }
 0x279   : > { %v1397_v63 = vadd.f32 %v4516_v60, %v1396_v62  ;;  %v4544_v60 = vld [vmem:[%s5613_s21 + $0x1] ss:$0 sm:$0xff] }
 0x27b   : > { %4887 = vmatprep.mubr.msk.f32.mxu0 %vm1577_vm15, %v1397_v63 }
 0x27e   : > { %4888 = vmatmul.mubr.msk.f32.vlgmr.msra.gmra.mrb[2].mxu0 %vm1577_vm15, %v1402_v0 }
 0x27f   : > { %4916 = vmatprep.mubr.msk.f32.mxu0 %vm1323_vm13, %v5725_v42  ;;  %v4882_v36 = vpop.f32.mrb[4].mxu1  ;;  %5182 = vmatpush3.bf16.msra.mxu0 %v5179_v35 }
 0x280   : > { %v1568_v38 = vpop.f32.mrb[5].mxu1  ;;  %v1574_v39 = vadd.f32 %v4882_v36, %v4522_v37  ;;  %5184 = vmatprep.subr.bf16.mxu0 %v5183_v44  ;;  %v4552_v36 = vld [vmem:[%s5628_s5 + $0x1] ss:$0 sm:$0xff] }
 0x281   : > { %v1569_v40 = vadd.f32 %v4522_v37, %v1568_v38 }
 0x283   : > { %v5167_v45 = vpack.c.bf16 %v1574_v39, %v1569_v40  ;;  %5186 = vmatpush3.bf16.msra.mxu0 %v5183_v44 }
 0x285   : > { %5168 = vmatprep.subr.bf16.mxu1 %v5167_v45 }
 0x286   : > { %5170 = vmatpush3.bf16.msra.mxu1 %v5167_v45  ;;  %4917 = vmatmul.mubr.msk.f32.vlgmr.msra.gmra.mrb[4].mxu0 %vm1323_vm13, %v5735_v49 }
 0x287   : > { %5172 = vmatprep.subr.bf16.mxu1 %v5171_v48 }
 0x351   : > { %v4889_v14 = vpop.f32.mrb[2].mxu0 }
 0x352   : > { %v1656_v17 = vpop.f32.mrb[3].mxu0  ;;  %v1662_v20 = vadd.f32 %v4889_v14, %v5776_v19  ;;  %v5187_v14 = vpack.c.bf16 %v4548_v12, %v4547_v11 }
 0x353   : > { %v1657_v18 = vadd.f32 %v1656_v17, %v5773_v16  ;;  %v5191_v17 = vpack.c.bf16 %v4550_v15, %v4549_v13  ;;  %v4582_v15 = vld [vmem:[%s5623_s27 + $0x40] sm:$0xff] }
 0x354   : > { %v1669_v22 = vsel %vm1665_vm7, %v1662_v20, -inf }
 0x355   : > { %v1666_v21 = vsel %vm1665_vm7, %v1657_v18, -inf }
 0x356   : > { %1667 = vmax.xlane.f32.xlu0 %v1666_v21 }
 0x359   : > { %v4918_v61 = vpop.f32.mrb[4].mxu0 }
 0x35a   : > { %1670 = vmax.xlane.f32.xlu0 %v1669_v22  ;;  %v1943_v62 = vadd.f32 %v4918_v61, %v4544_v60  ;;  %v1937_v63 = vpop.f32.mrb[5].mxu0 }
 0x35b   : > { %v1938_v0 = vadd.f32 %v4544_v60, %v1937_v63  ;;  %v4576_v63 = vld [vmem:[%s5608_s25 + $0x50] sm:$0xff] }
 0x35d   : > { %v5195_v3 = vpack.c.bf16 %v1943_v62, %v1938_v0  ;;  %v4577_v0 = vld [vmem:[%s5608_s25 + $0x58] sm:$0xff] }
 0x35f   : > { %5197 = vmatprep.subr.msk.bf16.mxu0 %vm5750_vm0, %v5195_v3 }
 0x360   : > { %5200 = vmatpush3.bf16.xpose.msk.msra.mxu0 %vm5750_vm0, %v5195_v3  ;;  %v5217_v3 = vpack.c.bf16 %v4577_v0, %v4576_v63  ;;  %v4609_v0 = vld [vmem:[%s5608_s25 + $0x70] sm:$0xff] }
 0x361   : > { %4944 = vmatprep.subr.mxu0 %v4561_v41 }
 0x3e3   : > { %v1668_v23 = vpop.xlane.xlu0 %1667 }
 0x3e4   : > { %v1672_v24 = vsub.f32 %v1657_v18, %v1668_v23 }
 0x3e6   : > { %v1674_v25 = vmul.f32 1.442695, %v1672_v24 }
 0x3e7   : > { %v1671_v26 = vpop.xlane.xlu0 %1670 }
 0x3e8   : > { %5342 = vpow2.f32 %v1674_v25  ;;  %v1673_v27 = vsub.f32 %v1662_v20, %v1671_v26 }
 0x3ea   : > { %v1676_v28 = vmul.f32 1.442695, %v1673_v27 }
 0x3ec   : > { %5344 = vpow2.f32 %v1676_v28 }
 0x3f2   : > { %v5343_v29 = vpop.eup %5342 }
 0x3f3   : > { %v1678_v30 = vsel %vm1665_vm7, %v5343_v29, 0.0 }
 0x3f4   : > { %1679 = vadd.xlane.f32.xlu1 %v1678_v30 }
 0x3f6   : > { %v5345_v31 = vpop.eup %5344 }
 0x3f7   : > { %v1681_v32 = vsel %vm1665_vm7, %v5345_v31, 0.0 }
 0x3f8   : > { %1682 = vadd.xlane.f32.xlu1 %v1681_v32 }
 0x481   : > { %v1680_v50 = vpop.xlane.xlu1 %1679 }
 0x482   : > { %5346 = vrcp.f32 %v1680_v50  ;;  %v1769_v50 = vld [vmem:[%s5643_s7] sm:$0xff] }
 0x485   : > { %v1683_v51 = vpop.xlane.xlu1 %1682 }
 0x486   : > { %5348 = vrcp.f32 %v1683_v51  ;;  %v4566_v51 = vld [vmem:[%s5598_s8 + $0x40] sm:$0xff] }
 0x48c   : > { %v5347_v52 = vpop.eup %5346 }
 0x48d   : > { %v1686_v53 = vmul.f32 %v5347_v52, %v5343_v29  ;;  %v4567_v52 = vld [vmem:[%s5598_s8 + $0x48] sm:$0xff] }
 0x48f   : > { %4894 = vmatprep.mubr.msk.f32.mxu1 %vm1665_vm7, %v1686_v53  ;;  %v5205_v53 = vpack.c.bf16 %v4567_v52, %v4566_v51 }
 0x490   : > { %v5349_v56 = vpop.eup %5348 }
 0x491   : > { %v1687_v57 = vmul.f32 %v5349_v56, %v5345_v31  ;;  %v5209_v56 = vpack.c.bf16 %v4569_v55, %v4568_v54  ;;  %v4607_v54 = vld [vmem:[%s5608_s25 + $0x60] sm:$0xff]  ;;  %v4608_v55 = vld [vmem:[%s5608_s25 + $0x68] sm:$0xff] }
 0x493   : > { %4895 = vmatmul.mubr.msk.f32.vlgmr.msra.gmra.mrb[6].mxu1 %vm1665_vm7, %v1687_v57  ;;  %v4574_v57 = vld [vmem:[%s5608_s25 + $0x40] sm:$0xff] }
 0x494   : > { %5174 = vmatpush3.bf16.msra.mxu1 %v5171_v48  ;;  %4905 = vmatprep.mubr.msk.f32.mxu1 %vm1323_vm13, %v5725_v42 }
 0x495   : > { %5176 = vmatprep.subr.bf16.mxu1 %v5175_v59 }
 0x498   : > { %5178 = vmatpush3.bf16.msra.mxu1 %v5175_v59  ;;  %v4575_v59 = vld [vmem:[%s5608_s25 + $0x48] sm:$0xff] }
 0x499   : > { %5188 = vmatprep.subr.bf16.mxu1 %v5187_v14  ;;  %v5213_v62 = vpack.c.bf16 %v4575_v59, %v4574_v57  ;;  %v4599_v57 = vld [vmem:[%s5598_s8 + $0x60] sm:$0xff]  ;;  %v4600_v59 = vld [vmem:[%s5598_s8 + $0x68] sm:$0xff] }
 0x49b   : > { %4906 = vmatmul.mubr.msk.f32.vlgmr.msra.gmra.mrb[8].mxu1 %vm1323_vm13, %v5735_v49 }
 0x49c   : > { %4927 = vmatprep.mubr.msk.f32.mxu1 %vm1323_vm13, %v5725_v42  ;;  %5190 = vmatpush3.bf16.msra.mxu1 %v5187_v14 }
 0x49d   : > { %5192 = vmatprep.subr.bf16.mxu1 %v5191_v17 }
 0x4a0   : > { %5194 = vmatpush3.bf16.msra.mxu1 %v5191_v17  ;;  %v4583_v17 = vld [vmem:[%s5623_s27 + $0x48] sm:$0xff] }
 0x4a3   : > { %4928 = vmatmul.mubr.msk.f32.vlgmr.msra.gmra.mrb[10].mxu1 %vm1323_vm13, %v5735_v49 }
 0x566   : > { %v5807_v4 = vpop.f32.mrb[6].mxu1 }
 0x567   : > { %v5809_v5 = vpop.f32.mrb[7].mxu1 }
 0x56e   : > { %v4907_v7 = vpop.f32.mrb[8].mxu1 }
 0x56f   : > { %v1849_v8 = vpop.f32.mrb[9].mxu1  ;;  %v1855_v10 = vadd.f32 %v4907_v7, %v4536_v6 }
 0x570   : > { %v1850_v9 = vadd.f32 %v4536_v6, %v1849_v8  ;;  %v4571_v6 = vld [vmem:[%s5603_s9 + $0x2] ss:$0 sm:$0xff] }
 0x572   : > { %4934 = vmatprep.mubr.msk.f32.mxu0 %vm1577_vm15, %v1850_v9 }
 0x573   : > { %4935 = vmatmul.mubr.msk.f32.vlgmr.msra.gmra.mrb[6].mxu0 %vm1577_vm15, %v1855_v10 }
 0x574   : > { %4945 = vmatpush3.msra.mxu0 %v4561_v41 }
 0x575   : > { %4949 = vmatprep.subr.mxu0 %v1769_v50 }
 0x576   : > { %v4929_v35 = vpop.f32.mrb[10].mxu1 }
 0x577   : > { %v2025_v37 = vpop.f32.mrb[11].mxu1  ;;  %v2031_v38 = vadd.f32 %v4929_v35, %v4552_v36 }
 0x578   : > { %v2026_v39 = vadd.f32 %v4552_v36, %v2025_v37 }
 0x57a   : > { %v5201_v40 = vpack.c.bf16 %v2031_v38, %v2026_v39 }
 0x57c   : > { %5202 = vmatprep.subr.bf16.mxu1 %v5201_v40 }
 0x57d   : > { %5204 = vmatpush3.bf16.msra.mxu1 %v5201_v40  ;;  %v4587_v40 = vld [vmem:[%s5628_s5 + $0x2] ss:$0 sm:$0xff] }
 0x57e   : > { %5206 = vmatprep.subr.bf16.mxu1 %v5205_v53 }
 0x646   : > { %v4936_v18 = vpop.f32.mrb[6].mxu0 }
 0x647   : > { %v2118_v20 = vadd.f32 %v4936_v18, %v5776_v19  ;;  %v2112_v21 = vpop.f32.mrb[7].mxu0  ;;  %v4584_v18 = vld [vmem:[%s5623_s27 + $0x50] sm:$0xff] }
 0x648   : > { %v2113_v22 = vadd.f32 %v2112_v21, %v5773_v16  ;;  %v4585_v21 = vld [vmem:[%s5623_s27 + $0x58] sm:$0xff] }
 0x649   : > { %v2124_v23 = vsel %vm1665_vm7, %v2118_v20, -inf }
 0x64a   : > { %2125 = vmax.xlane.f32.xlu1 %v2124_v23  ;;  %v2121_v24 = vsel %vm1665_vm7, %v2113_v22, -inf }
 0x64b   : > { %2122 = vmax.xlane.f32.xlu0 %v2121_v24 }
 0x6d7   : > { %v2126_v25 = vpop.xlane.xlu1 %2125 }
 0x6d8   : > { %v2128_v26 = vsub.f32 %v2118_v20, %v2126_v25  ;;  %v2123_v27 = vpop.xlane.xlu0 %2122  ;;  %v5221_v20 = vpack.c.bf16 %v4583_v17, %v4582_v15 }
 0x6d9   : > { %v2127_v28 = vsub.f32 %v2113_v22, %v2123_v27  ;;  %v5225_v22 = vpack.c.bf16 %v4585_v21, %v4584_v18  ;;  %v4616_v21 = vld [vmem:[%s5623_s27 + $0x68] sm:$0xff] }
 0x6da   : > { %v2131_v29 = vmul.f32 1.442695, %v2128_v26 }
 0x6db   : > { %v2129_v30 = vmul.f32 1.442695, %v2127_v28 }
 0x6dc   : > { %5350 = vpow2.f32 %v2131_v29 }
 0x6dd   : > { %5352 = vpow2.f32 %v2129_v30 }
 0x6e6   : > { %v5351_v31 = vpop.eup %5350 }
 0x6e7   : > { %v5353_v32 = vpop.eup %5352  ;;  %v2136_v33 = vsel %vm1665_vm7, %v5351_v31, 0.0 }
 0x6e8   : > { %2137 = vadd.xlane.f32.xlu1 %v2136_v33  ;;  %v2133_v34 = vsel %vm1665_vm7, %v5353_v32, 0.0 }
 0x6e9   : > { %2134 = vadd.xlane.f32.xlu0 %v2133_v34 }
 0x775   : > { %v2138_v43 = vpop.xlane.xlu1 %2137 }
 0x776   : > { %5354 = vrcp.f32 %v2138_v43  ;;  %v2135_v44 = vpop.xlane.xlu0 %2134 }
 0x777   : > { %5356 = vrcp.f32 %v2135_v44 }
 0x780   : > { %v5355_v45 = vpop.eup %5354 }
 0x781   : > { %v5357_v46 = vpop.eup %5356  ;;  %v2142_v48 = vmul.f32 %v5355_v45, %v5351_v31 }
 0x782   : > { %v2141_v47 = vmul.f32 %v5357_v46, %v5353_v32  ;;  %v4596_v46 = vld [vmem:[%s5643_s7 + $0x10] sm:$0xff] }
 0x784   : > { %4941 = vmatprep.mubr.msk.f32.mxu1 %vm1665_vm7, %v2141_v47 }
 0x785   : > { %4942 = vmatmul.mubr.msk.f32.vlgmr.msra.gmra.mrb[12].mxu1 %vm1665_vm7, %v2142_v48 }
 0x786   : > { %4962 = vmatprep.mubr.msk.f32.mxu1 %vm1323_vm13, %v5725_v42  ;;  %5208 = vmatpush3.bf16.msra.mxu1 %v5205_v53 }
 0x787   : > { %5210 = vmatprep.subr.bf16.mxu1 %v5209_v56 }
 0x78a   : > { %5212 = vmatpush3.bf16.msra.mxu1 %v5209_v56  ;;  %v5247_v56 = vpack.c.bf16 %v4608_v55, %v4607_v54 }
 0x78b   : > { %5222 = vmatprep.subr.bf16.mxu1 %v5221_v20 }
 0x78d   : > { %4963 = vmatmul.mubr.msk.f32.vlgmr.msra.gmra.mrb[14].mxu1 %vm1323_vm13, %v5735_v49 }
 0x78e   : > { %4984 = vmatprep.mubr.msk.f32.mxu1 %vm1323_vm13, %v5725_v42  ;;  %5224 = vmatpush3.bf16.msra.mxu1 %v5221_v20  ;;  %v4615_v20 = vld [vmem:[%s5623_s27 + $0x60] sm:$0xff] }
 0x78f   : > { %5226 = vmatprep.subr.bf16.mxu1 %v5225_v22 }
 0x792   : > { %5228 = vmatpush3.bf16.msra.mxu1 %v5225_v22  ;;  %v4617_v22 = vld [vmem:[%s5623_s27 + $0x70] sm:$0xff] }
 0x795   : > { %4985 = vmatmul.mubr.msk.f32.vlgmr.msra.gmra.mrb[16].mxu1 %vm1323_vm13, %v5735_v49 }
 0x858   : > { %v4943_v60 = vpop.f32.mrb[12].mxu1 }
 0x859   : > { %v2215_v61 = vpop.f32.mrb[13].mxu1 }
 0x85a   : > { %4946 = vmatprep.mubr.msk.f32.mxu0 %vm1577_vm15, %v2215_v61  ;;  %v4601_v61 = vld [vmem:[%s5598_s8 + $0x70] sm:$0xff] }
 0x85b   : > { %4947 = vmatmul.mubr.msk.f32.vlgmr.msra.gmra.mrb[8].mxu0 %vm1577_vm15, %v4943_v60  ;;  %v5239_v60 = vpack.c.bf16 %v4600_v59, %v4599_v57 }
 0x85c   : > { %4950 = vmatpush3.msra.mxu0 %v1769_v50  ;;  %4951 = vmatprep.mubr.msk.f32.mxu0 %vm1577_vm15, %v5809_v5 }
 0x85d   : > { %5214 = vmatprep.subr.bf16.mxu0 %v5213_v62 }
 0x860   : > { %v4964_v5 = vpop.f32.mrb[14].mxu1 }
 0x861   : > { %v2473_v7 = vadd.f32 %v4964_v5, %v4571_v6  ;;  %v2467_v8 = vpop.f32.mrb[15].mxu1 }
 0x862   : > { %v2468_v9 = vadd.f32 %v4571_v6, %v2467_v8  ;;  %v4604_v8 = vld [vmem:[%s5603_s9 + $0x3] ss:$0 sm:$0xff] }
 0x863   : > { %4952 = vmatmul.mubr.msk.f32.vlgmr.msra.gmra.mrb[8].mxu0 %vm1577_vm15, %v5807_v4  ;;  %v4579_v4 = vld [vmem:[%s5613_s21 + $0x2] ss:$0 sm:$0xff] }
 0x864   : > { %5216 = vmatpush3.bf16.msra.mxu0 %v5213_v62  ;;  %4973 = vmatprep.mubr.msk.f32.mxu0 %vm1323_vm13, %v5725_v42  ;;  %v4602_v62 = vld [vmem:[%s5598_s8 + $0x78] sm:$0xff]  ;;  %s6119_s8 = scalar_lea.vmem %s6053_s11, %s5584_s6 }
 0x865   : > { %5218 = vmatprep.subr.bf16.mxu0 %v5217_v3  ;;  %v5243_v63 = vpack.c.bf16 %v4602_v62, %v4601_v61 }
 0x868   : > { %5220 = vmatpush3.bf16.msra.mxu0 %v5217_v3  ;;  %v4986_v39 = vpop.f32.mrb[16].mxu1  ;;  %v4610_v3 = vld [vmem:[%s5608_s25 + $0x78] sm:$0xff]  ;;  %s6126_s25 = sld [smem:[#allocation22_spill]] (!%p4643_p5) }
 0x869   : > { %v2643_v41 = vpop.f32.mrb[17].mxu1  ;;  %v2649_v43 = vadd.f32 %v4986_v39, %v4587_v40 }
 0x86a   : > { %v2644_v44 = vadd.f32 %v4587_v40, %v2643_v41  ;;  %v4620_v40 = vld [vmem:[%s5628_s5 + $0x3] ss:$0 sm:$0xff] }
 0x86b   : > { %4974 = vmatmul.mubr.msk.f32.vlgmr.msra.gmra.mrb[10].mxu0 %vm1323_vm13, %v5735_v49 }
 0x86c   : > { %4991 = vmatprep.mubr.msk.f32.mxu0 %vm1577_vm15, %v2468_v9  ;;  %v5235_v45 = vpack.c.bf16 %v2649_v43, %v2644_v44 }
 0x86e   : > { %5236 = vmatprep.subr.bf16.mxu1 %v5235_v45 }
 0x86f   : > { %5238 = vmatpush3.bf16.msra.mxu1 %v5235_v45 }
 0x870   : > { %5240 = vmatprep.subr.bf16.mxu1 %v5239_v60 }
 0x93e   : > { %v4975_v10 = vpop.f32.mrb[10].mxu0 }
 0x93f   : > { %v2561_v11 = vadd.f32 %v4975_v10, %v4579_v4  ;;  %v2555_v12 = vpop.f32.mrb[11].mxu0 }
 0x940   : > { %v2556_v13 = vadd.f32 %v4579_v4, %v2555_v12  ;;  %v4612_v12 = vld [vmem:[%s5613_s21 + $0x3] ss:$0 sm:$0xff]  ;;  %s6133_s21 = sld [smem:[#allocation25_spill]] (!%p4643_p5) }
 0x942   : > { %v5229_v14 = vpack.c.bf16 %v2561_v11, %v2556_v13 }
 0x944   : > { %5231 = vmatprep.subr.msk.bf16.mxu0 %vm5750_vm0, %v5229_v14 }
 0x945   : > { %5234 = vmatpush3.bf16.xpose.msk.msra.mxu0 %vm5750_vm0, %v5229_v14 }
 0x946   : > { %5001 = vmatprep.subr.mxu0 %v4596_v46 }
 0x94c   : > { %4992 = vmatmul.mubr.msk.f32.vlgmr.msra.gmra.mrb[12].mxu0 %vm1577_vm15, %v2473_v7  ;;  %v5251_v7 = vpack.c.bf16 %v4610_v3, %v4609_v0 }
 0x94d   : > { %5002 = vmatpush3.msra.mxu0 %v4596_v46  ;;  %v4629_v46 = vld [vmem:[%s5643_s7 + $0x18] sm:$0xff] }
 0x94e   : > { %5248 = vmatprep.subr.bf16.mxu0 %v5247_v56 }
 0xa1f   : > { %v4993_v23 = vpop.f32.mrb[12].mxu0 }
 0xa20   : > { %v2736_v24 = vadd.f32 %v4993_v23, %v5776_v19  ;;  %v2730_v25 = vpop.f32.mrb[13].mxu0  ;;  %v5255_v23 = vpack.c.bf16 %v4616_v21, %v4615_v20  ;;  %v3624_v20 = vld [vmem:[%s5674_s23 + $0x20] sm:$0xff]  ;;  %v3625_v21 = vld [vmem:[%s5674_s23 + $0x28] sm:$0xff] }
 0xa21   : > { %v2731_v26 = vadd.f32 %v2730_v25, %v5773_v16 }
 0xa22   : > { %v2742_v27 = vsel %vm1665_vm7, %v2736_v24, -inf }
 0xa23   : > { %2743 = vmax.xlane.f32.xlu1 %v2742_v27  ;;  %v2739_v28 = vsel %vm1665_vm7, %v2731_v26, -inf }
 0xa24   : > { %2740 = vmax.xlane.f32.xlu0 %v2739_v28 }
 0xab0   : > { %v2744_v29 = vpop.xlane.xlu1 %2743 }
 0xab1   : > { %v2746_v30 = vsub.f32 %v2736_v24, %v2744_v29  ;;  %v2741_v31 = vpop.xlane.xlu0 %2740  ;;  %v4618_v24 = vld [vmem:[%s5623_s27 + $0x78] sm:$0xff]  ;;  %s6120_s27 = sld [smem:[#allocation15_spill]] }
 0xab2   : > { %v2745_v32 = vsub.f32 %v2731_v26, %v2741_v31  ;;  %v5259_v25 = vpack.c.bf16 %v4618_v24, %v4617_v22  ;;  %v5289_v22 = vpack.c.bf16 %v3625_v21, %v3624_v20 }
 0xab3   : > { %v2749_v33 = vmul.f32 1.442695, %v2746_v30 }
 0xab4   : > { %v2747_v34 = vmul.f32 1.442695, %v2745_v32 }
 0xab5   : > { %5358 = vpow2.f32 %v2749_v33 }
 0xab6   : > { %5360 = vpow2.f32 %v2747_v34 }
 0xab7   : > { %s6121_s5 = scalar_lea.vmem %s6120_s27, %s5584_s6 }
 0xabf   : > { %v5359_v35 = vpop.eup %5358 }
 0xac0   : > { %v5361_v36 = vpop.eup %5360  ;;  %v2754_v37 = vsel %vm1665_vm7, %v5359_v35, 0.0 }
 0xac1   : > { %2755 = vadd.xlane.f32.xlu1 %v2754_v37  ;;  %v2751_v38 = vsel %vm1665_vm7, %v5361_v36, 0.0 }
 0xac2   : > { %2752 = vadd.xlane.f32.xlu0 %v2751_v38 }
 0xb4e   : > { %v2756_v47 = vpop.xlane.xlu1 %2755 }
 0xb4f   : > { %5362 = vrcp.f32 %v2756_v47  ;;  %v2753_v48 = vpop.xlane.xlu0 %2752 }
 0xb50   : > { %5364 = vrcp.f32 %v2753_v48 }
 0xb59   : > { %v5363_v50 = vpop.eup %5362 }
 0xb5a   : > { %v5365_v51 = vpop.eup %5364  ;;  %v2760_v53 = vmul.f32 %v5363_v50, %v5359_v35 }
 0xb5b   : > { %v2759_v52 = vmul.f32 %v5365_v51, %v5361_v36 }
 0xb5d   : > { %4998 = vmatprep.mubr.msk.f32.mxu1 %vm1665_vm7, %v2759_v52 }
 0xb5e   : > { %4999 = vmatmul.mubr.msk.f32.vlgmr.msra.gmra.mrb[18].mxu1 %vm1665_vm7, %v2760_v53 }
 0xb5f   : > { %5014 = vmatprep.mubr.msk.f32.mxu1 %vm1323_vm13, %v5725_v42  ;;  %5242 = vmatpush3.bf16.msra.mxu1 %v5239_v60 }
 0xb60   : > { %5244 = vmatprep.subr.bf16.mxu1 %v5243_v63 }
 0xb63   : > { %5246 = vmatpush3.bf16.msra.mxu1 %v5243_v63 }
 0xb64   : > { %5256 = vmatprep.subr.bf16.mxu1 %v5255_v23 }
 0xb66   : > { %5015 = vmatmul.mubr.msk.f32.vlgmr.msra.gmra.mrb[20].mxu1 %vm1323_vm13, %v5735_v49 }
 0xb67   : > { %5036 = vmatprep.mubr.msk.f32.mxu1 %vm1323_vm13, %v5725_v42  ;;  %5258 = vmatpush3.bf16.msra.mxu1 %v5255_v23 }
 0xb68   : > { %5260 = vmatprep.subr.bf16.mxu1 %v5259_v25 }
 0xb6b   : > { %5262 = vmatpush3.bf16.msra.mxu1 %v5259_v25 }
 0xb6e   : > { %5037 = vmatmul.mubr.msk.f32.vlgmr.msra.gmra.mrb[22].mxu1 %vm1323_vm13, %v5735_v49 }
 0xc31   : > { %v5000_v6 = vpop.f32.mrb[18].mxu1 }
 0xc32   : > { %v2833_v5 = vpop.f32.mrb[19].mxu1 }
 0xc33   : > { %5003 = vmatprep.mubr.msk.f32.mxu0 %vm1577_vm15, %v2833_v5 }
 0xc34   : > { %5004 = vmatmul.mubr.msk.f32.vlgmr.msra.gmra.mrb[8].mxu0 %vm1577_vm15, %v5000_v6 }
 0xc35   : > { %5250 = vmatpush3.bf16.msra.mxu0 %v5247_v56  ;;  %5025 = vmatprep.mubr.msk.f32.mxu0 %vm1323_vm13, %v5725_v42  ;;  %v4632_v56 = vld [vmem:[%s6119_s8] ss:$0 sm:$0xff]  ;;  %s6127_s8 = sld [smem:[#allocation21_spill]] (!%p4643_p5) }
 0xc36   : > { %5252 = vmatprep.subr.bf16.mxu0 %v5251_v7 }
 0xc39   : > { %5254 = vmatpush3.bf16.msra.mxu0 %v5251_v7  ;;  %v5016_v9 = vpop.f32.mrb[20].mxu1 }
 0xc3a   : > { %v3012_v4 = vadd.f32 %v5016_v9, %v4604_v8  ;;  %v3006_v10 = vpop.f32.mrb[21].mxu1  ;;  %v3528_v9 = vld [vmem:[%s5658_s22 + $0x10] sm:$0xff] }
 0xc3b   : > { %v3007_v11 = vadd.f32 %v4604_v8, %v3006_v10  ;;  %v3529_v10 = vld [vmem:[%s5658_s22 + $0x18] sm:$0xff] }
 0xc3c   : > { %5026 = vmatmul.mubr.msk.f32.vlgmr.msra.gmra.mrb[14].mxu0 %vm1323_vm13, %v5735_v49 }
 0xc3d   : > { %5043 = vmatprep.mubr.msk.f32.mxu0 %vm1577_vm15, %v3007_v11  ;;  %v5277_v11 = vpack.c.bf16 %v3529_v10, %v3528_v9 }
 0xc41   : > { %v5038_v39 = vpop.f32.mrb[22].mxu1 }
 0xc42   : > { %v3182_v41 = vpop.f32.mrb[23].mxu1  ;;  %v3188_v43 = vadd.f32 %v5038_v39, %v4620_v40 }
 0xc43   : > { %v3183_v44 = vadd.f32 %v4620_v40, %v3182_v41  ;;  %v4634_v41 = vld [vmem:[%s6123_s16] ss:$0 sm:$0xff] }
 0xc45   : > { %v5269_v45 = vpack.c.bf16 %v3188_v43, %v3183_v44 }
 0xc47   : > { %5270 = vmatprep.subr.bf16.mxu1 %v5269_v45 }
 0xc48   : > { %5272 = vmatpush3.bf16.msra.mxu1 %v5269_v45 }
 0xd0f   : > { %v5027_v13 = vpop.f32.mrb[14].mxu0 }
 0xd10   : > { %v3100_v14 = vadd.f32 %v5027_v13, %v4612_v12  ;;  %v3094_v15 = vpop.f32.mrb[15].mxu0  ;;  %v3621_v13 = vld [vmem:[%s5674_s23 + $0x8] sm:$0xff] }
 0xd11   : > { %v3095_v17 = vadd.f32 %v4612_v12, %v3094_v15  ;;  %v3620_v12 = vld [vmem:[%s5674_s23] sm:$0xff] }
 0xd12   : > { %v5281_v15 = vpack.c.bf16 %v3621_v13, %v3620_v12 }
 0xd13   : > { %v5263_v18 = vpack.c.bf16 %v3100_v14, %v3095_v17  ;;  %v3622_v14 = vld [vmem:[%s5674_s23 + $0x10] sm:$0xff]  ;;  %v3623_v17 = vld [vmem:[%s5674_s23 + $0x18] sm:$0xff] }
 0xd15   : > { %5265 = vmatprep.subr.msk.bf16.mxu0 %vm5750_vm0, %v5263_v18 }
 0xd16   : > { %5268 = vmatpush3.bf16.xpose.msk.msra.mxu0 %vm5750_vm0, %v5263_v18  ;;  %v5285_v18 = vpack.c.bf16 %v3623_v17, %v3622_v14 }
 0xd17   : > { %5053 = vmatprep.subr.mxu0 %v4629_v46 }
 0xd1d   : > { %5044 = vmatmul.mubr.msk.f32.vlgmr.msra.gmra.mrb[16].mxu0 %vm1577_vm15, %v3012_v4 }
 0xd1e   : > { %5054 = vmatpush3.msra.mxu0 %v4629_v46 }
 0xd1f   : > { %5282 = vmatprep.subr.bf16.mxu0 %v5281_v15 }
 0xdf0   : > { %v5045_v26 = vpop.f32.mrb[16].mxu0 }
 0xdf1   : > { %v3275_v27 = vadd.f32 %v5045_v26, %v5776_v19  ;;  %v3269_v58 = vpop.f32.mrb[17].mxu0 }
 0xdf2   : > { %v3270_v28 = vadd.f32 %v3269_v58, %v5773_v16 }
 0xdf3   : > { %v3281_v29 = vsel %vm1665_vm7, %v3275_v27, -inf }
 0xdf4   : > { %3282 = vmax.xlane.f32.xlu1 %v3281_v29  ;;  %v3278_v30 = vsel %vm1665_vm7, %v3270_v28, -inf }
 0xdf5   : > { %3279 = vmax.xlane.f32.xlu0 %v3278_v30 }
 0xe81   : > { %v3283_v31 = vpop.xlane.xlu1 %3282 }
 0xe82   : > { %v3285_v32 = vsub.f32 %v3275_v27, %v3283_v31  ;;  %v3280_v33 = vpop.xlane.xlu0 %3279 }
 0xe83   : > { %v3284_v34 = vsub.f32 %v3270_v28, %v3280_v33 }
 0xe84   : > { %v3288_v35 = vmul.f32 1.442695, %v3285_v32 }
 0xe85   : > { %v3286_v36 = vmul.f32 1.442695, %v3284_v34 }
 0xe86   : > { %5366 = vpow2.f32 %v3288_v35 }
 0xe87   : > { %5368 = vpow2.f32 %v3286_v36 }
 0xe90   : > { %v5367_v19 = vpop.eup %5366 }
 0xe91   : > { %v5369_v37 = vpop.eup %5368  ;;  %v3293_v16 = vsel %vm1665_vm7, %v5367_v19, 0.0 }
 0xe92   : > { %3294 = vadd.xlane.f32.xlu1 %v3293_v16  ;;  %v3290_v38 = vsel %vm1665_vm7, %v5369_v37, 0.0  ;;  %v4633_v16 = vld [vmem:[%s6121_s5] ss:$0 sm:$0xff]  ;;  %s6128_s5 = sld [smem:[#allocation20_spill]] (!%p4643_p5) }
 0xe93   : > { %3291 = vadd.xlane.f32.xlu0 %v3290_v38 }
 0xf1f   : > { %v3295_v47 = vpop.xlane.xlu1 %3294 }
 0xf20   : > { %5370 = vrcp.f32 %v3295_v47  ;;  %v3292_v48 = vpop.xlane.xlu0 %3291  ;;  %v3626_v47 = vld [vmem:[%s5674_s23 + $0x30] sm:$0xff] }
 0xf21   : > { %5372 = vrcp.f32 %v3292_v48  ;;  %v3627_v48 = vld [vmem:[%s5674_s23 + $0x38] sm:$0xff] }
 0xf2a   : > { %v5371_v50 = vpop.eup %5370 }
 0xf2b   : > { %v5373_v51 = vpop.eup %5372  ;;  %v3299_v53 = vmul.f32 %v5371_v50, %v5367_v19  ;;  %v5293_v50 = vpack.c.bf16 %v3627_v48, %v3626_v47 }
 0xf2c   : > { %v3298_v52 = vmul.f32 %v5373_v51, %v5369_v37  ;;  %v4635_v51 = vld [vmem:[%s6125_s20] ss:$0 sm:$0xff] }
 0xf2e   : > { %5050 = vmatprep.mubr.msk.f32.mxu1 %vm1665_vm7, %v3298_v52 }
 0xf2f   : > { %5051 = vmatmul.mubr.msk.f32.vlgmr.msra.gmra.mrb[24].mxu1 %vm1665_vm7, %v3299_v53 }
0x1002   : > { %v5052_v54 = vpop.f32.mrb[24].mxu1 }
0x1003   : > { %v3372_v55 = vpop.f32.mrb[25].mxu1 }
0x1004   : > { %5055 = vmatprep.mubr.msk.f32.mxu0 %vm1577_vm15, %v3372_v55 }
0x1005   : > { %5056 = vmatmul.mubr.msk.f32.vlgmr.msra.gmra.mrb[8].mxu0 %vm1577_vm15, %v5052_v54 }
0x1006   : > { %5284 = vmatpush3.bf16.msra.mxu0 %v5281_v15 }
0x1007   : > { %5286 = vmatprep.subr.bf16.mxu0 %v5285_v18 }
0x100a   : > { %5288 = vmatpush3.bf16.msra.mxu0 %v5285_v18 }
0x100b   : > { %5290 = vmatprep.subr.bf16.mxu0 %v5289_v22 }
0x100e   : > { %5292 = vmatpush3.bf16.msra.mxu0 %v5289_v22 }
0x100f   : > { %5294 = vmatprep.subr.bf16.mxu0 %v5293_v50 }
0x1012   : > { %5296 = vmatpush3.bf16.msra.mxu0 %v5293_v50 }
0x10d8   : > { %v5057_v57 = vpop.f32.mrb[8].mxu0 }
0x10d9   : > { %v3474_v59 = vadd.f32 %v5057_v57, %v4632_v56  ;;  %v3455_v60 = vpop.f32.mrb[9].mxu0 }
0x10da   : > { %v3473_v61 = vadd.f32 %v4632_v56, %v3455_v60 }
0x10db   : > { %v3476_v62 = vadd.f32 %v3474_v59, %v5735_v49  ;;  %v3526_v49 = vld [vmem:[%s5658_s22] sm:$0xff] }
0x10dc   : > { %v3475_v63 = vadd.f32 %v3473_v61, %v5725_v42  ;;  %v3527_v42 = vld [vmem:[%s5658_s22 + $0x8] sm:$0xff]  ;;  %v4638_v59 = vld [vmem:[%s990_s24] ss:$0 sm:$0xff] }
0x10dd   : > { %v3482_v0 = vsel %vm1323_vm13, %v3476_v62, 0.0  ;;  %v3489_v3 = vmul.f32 %v3476_v62, %v3476_v62  ;;  %v5273_v4 = vpack.c.bf16 %v3527_v42, %v3526_v49 }
0x10de   : > { %3483 = vadd.xlane.f32.xlu1 %v3482_v0  ;;  %v3479_v6 = vsel %vm1323_vm13, %v3475_v63, 0.0  ;;  %v3488_v5 = vmul.f32 %v3475_v63, %v3475_v63 }
0x10df   : > { %3480 = vadd.xlane.f32.xlu0 %v3479_v6  ;;  %v3493_v7 = vsel %vm1323_vm13, %v3489_v3, 0.0  ;;  %5274 = vmatprep.subr.bf16.mxu1 %v5273_v4 }
0x10e0   : > { %v3490_v8 = vsel %vm1323_vm13, %v3488_v5, 0.0  ;;  %5276 = vmatpush3.bf16.msra.mxu1 %v5273_v4 }
0x10e1   : > { %5278 = vmatprep.subr.bf16.mxu1 %v5277_v11 }
0x10e2   : > { %3494 = vadd.xlane.f32.xlu1 %v3493_v7 }
0x10e3   : > { %3491 = vadd.xlane.f32.xlu0 %v3490_v8 }
0x10e4   : > { %5280 = vmatpush3.bf16.msra.mxu1 %v5277_v11 }
0x116b   : > { %v3484_v23 = vpop.xlane.xlu1 %3483 }
0x116c   : > { %v3487_v24 = vmul.f32 0.03125, %v3484_v23  ;;  %v3481_v25 = vpop.xlane.xlu0 %3480 }
0x116d   : > { %v3486_v26 = vmul.f32 0.03125, %v3481_v25 }
0x116e   : > { %v3499_v58 = vmul.f32 %v3487_v24, %v3487_v24  ;;  %v3503_v36 = vsub.f32 %v3476_v62, %v3487_v24 }
0x116f   : > { %v3495_v27 = vpop.xlane.xlu1 %3494  ;;  %v3498_v30 = vmul.f32 %v3486_v26, %v3486_v26  ;;  %v3502_v37 = vsub.f32 %v3475_v63, %v3486_v26 }
0x1170   : > { %v3497_v28 = vmul.f32 0.03125, %v3495_v27  ;;  %v3492_v29 = vpop.xlane.xlu0 %3491  ;;  %v4641_v27 = vld [vmem:[%s993_s14] ss:$0 sm:$0xff] }
0x1171   : > { %v3496_v31 = vmul.f32 0.03125, %v3492_v29  ;;  %v4642_v29 = vld [vmem:[%s996_s30] ss:$0 sm:$0xff] }
0x1172   : > { %v3501_v32 = vsub.f32 %v3497_v28, %v3499_v58 }
0x1173   : > { %v3500_v33 = vsub.f32 %v3496_v31, %v3498_v30 }
0x1174   : > { %v3505_v34 = vadd.f32 1e-05, %v3501_v32 }
0x1175   : > { %v3504_v35 = vadd.f32 1e-05, %v3500_v33 }
0x1176   : > { %5374 = vrsqrt.f32 %v3505_v34 }
0x1177   : > { %5376 = vrsqrt.f32 %v3504_v35  ;;  %v3866_v35 = vld [vmem:[%s6126_s25] sm:$0x3] (!%p4643_p5) }
0x1180   : > { %v5375_v19 = vpop.eup %5374 }
0x1181   : > { %v5377_v38 = vpop.eup %5376  ;;  %v3509_v39 = vmul.f32 %v5375_v19, %v3503_v36 }
0x1182   : > { %v3508_v40 = vmul.f32 %v5377_v38, %v3502_v37  ;;  %v5436_v37 = vmov (!%p4643_p5), 0  }
0x1183   : > { %v3517_v43 = vmul.f32 %v4633_v16, %v3509_v39  ;;  %5382 = vset.pattern.permute.xlu0 (!%p4643_p5), %v5436_v37  ;;  %v3775_v39 = vmul.u32 (!%p4643_p5), 8, %v5586_v1  ;;  %v4080_v1 = vld [vmem:[%s6129_s26] sm:$0x3] (!%p4643_p5) }
0x1184   : > { %v3516_v44 = vmul.f32 %v4633_v16, %v3508_v40  ;;  %v5437_v16 = vmov (!%p4643_p5), 0.0|0.0   ;;  %v3953_v40 = vld [vmem:[%s6127_s8] sm:$0xff] (!%p4643_p5) }
0x1185   : > { %v3525_v46 = vadd.f32 %v4634_v41, %v3517_v43  ;;  %5297 = vmatprep.subr.bf16.mxu0 (!%p4643_p5), %v5437_v16  ;;  %v3954_v43 = vld [vmem:[%s6127_s8 + $0x8] sm:$0x3] (!%p4643_p5)  ;;  %vm3776_vm11 = vcmp.eq.s32.totalorder (!%p4643_p5), %v5588_v2, %v3775_v39  ;;  %5300 = vmatprep.subr.bf16.mxu1 (!%p4643_p5), %v5437_v16 }
0x1186   : > { %v3524_v45 = vadd.f32 %v4634_v41, %v3516_v44  ;;  %v5439_v41 = vmov (!%p4643_p5), 0.0   ;;  %v3873_v44 = vld [vmem:[%s6128_s5] sm:$0xff] (!%p4643_p5) }
0x1187   : > { %v4644_v47 = vsel (!%p4643_p5), %vm3776_vm11, 1.0, %v5439_v41 }
0x1188   : > { %5066 = vmatprep.mubr.msk.f32.mxu1 %vm1323_vm13, %v3524_v45 }
0x1189   : > { %5067 = vmatmul.mubr.msk.f32.vlgmr.msra.gmra.mrb[26].mxu1 %vm1323_vm13, %v3525_v46 }
0x118a   : > { %5099 = vmatprep.mubr.msk.f32.mxu1 (!%p4643_p5), %vm5438_vm9, %v5439_v41 }
0x125c   : > { %v5068_v52 = vpop.f32.mrb[26].mxu1 }
0x125d   : > { %v3615_v53 = vadd.f32 %v5068_v52, %v4635_v51  ;;  %v3609_v54 = vpop.f32.mrb[27].mxu1  ;;  %v4088_v52 = vld [vmem:[%s6128_s5 + $0x8] sm:$0x3] (!%p4643_p5) }
0x125e   : > { %v3610_v55 = vadd.f32 %v4635_v51, %v3609_v54  ;;  %v4166_v51 = vld [vmem:[%s6127_s8 + $0x8] sm:$0x3] (!%p4643_p5) }
0x125f   : > { %v3619_v57 = vmax.f32 %v3615_v53, 0.0  ;;  %v5313_v54 = vpack.c.bf16 (!%p4643_p5), %v4166_v51, %v3953_v40 }
0x1260   : > { %v3618_v56 = vmax.f32 %v3610_v55, 0.0  ;;  %v5309_v55 = vpack.c.bf16 (!%p4643_p5), %v4088_v52, %v3873_v44 }
0x1262   : > { %5085 = vmatprep.mubr.msk.f32.mxu0 %vm3635_vm8, %v3618_v56 }
0x1263   : > { %5086 = vmatmul.mubr.msk.f32.vlgmr.msra.gmra.mrb[18].mxu0 %vm3635_vm8, %v3619_v57 }
0x1264   : > { %5092 = vmatprep.mubr.msk.f32.mxu0 (!%p4643_p5), %vm5438_vm9, %v5439_v41 }
0x1336   : > { %v5087_v60 = vpop.f32.mrb[18].mxu0 }
0x1337   : > { %v3714_v61 = vadd.f32 %v5087_v60, %v4638_v59  ;;  %v3708_v62 = vpop.f32.mrb[19].mxu0 }
0x1338   : > { %v3709_v63 = vadd.f32 %v4638_v59, %v3708_v62 }
0x1339   : > { %v3718_v0 = vadd.f32 %v3714_v61, %v3525_v46  ;;  %v3874_v46 = vld [vmem:[%s6128_s5 + $0x8] sm:$0x3] (!%p4643_p5) }
0x133a   : > { %v3717_v3 = vadd.f32 %v3709_v63, %v3524_v45  ;;  %v5305_v45 = vpack.c.bf16 (!%p4643_p5), %v3954_v43, %v3953_v40  ;;  %v5301_v50 = vpack.c.bf16 (!%p4643_p5), %v3874_v46, %v3873_v44 }
0x133b   : > { %v3724_v6 = vsel %vm1323_vm13, %v3718_v0, 0.0  ;;  %v3730_v5 = vmul.f32 %v3718_v0, %v3718_v0 }
0x133c   : > { %3725 = vadd.xlane.f32.xlu1 %v3724_v6  ;;  %v3721_v7 = vsel %vm1323_vm13, %v3717_v3, 0.0  ;;  %v3729_v8 = vmul.f32 %v3717_v3, %v3717_v3 }
0x133d   : > { %3722 = vadd.xlane.f32.xlu0 %v3721_v7  ;;  %v3734_v49 = vsel %vm1323_vm13, %v3730_v5, 0.0 }
0x133e   : > { %v3731_v42 = vsel %vm1323_vm13, %v3729_v8, 0.0 }
0x1340   : > { %3735 = vadd.xlane.f32.xlu1 %v3734_v49 }
0x1341   : > { %3732 = vadd.xlane.f32.xlu0 %v3731_v42 }
0x1357   : > { %3868 = vperm.xlu0 (!%p4643_p5), %5382, %v3866_v35  }
0x135b   : > { %4082 = vperm.xlu0 (!%p4643_p5), %5382, %v4080_v1  }
0x13c9   : > { %v3726_v9 = vpop.xlane.xlu1 %3725 }
0x13ca   : > { %v3728_v4 = vmul.f32 0.03125, %v3726_v9  ;;  %v3723_v10 = vpop.xlane.xlu0 %3722 }
0x13cb   : > { %v3727_v11 = vmul.f32 0.03125, %v3723_v10 }
0x13cc   : > { %v3740_v13 = vmul.f32 %v3728_v4, %v3728_v4  ;;  %v3744_v24 = vsub.f32 %v3718_v0, %v3728_v4 }
0x13cd   : > { %v3736_v12 = vpop.xlane.xlu1 %3735  ;;  %v3739_v17 = vmul.f32 %v3727_v11, %v3727_v11  ;;  %v3743_v26 = vsub.f32 %v3717_v3, %v3727_v11 }
0x13ce   : > { %v3738_v14 = vmul.f32 0.03125, %v3736_v12  ;;  %v3733_v15 = vpop.xlane.xlu0 %3732 }
0x13cf   : > { %v3737_v18 = vmul.f32 0.03125, %v3733_v15 }
0x13d0   : > { %v3742_v20 = vsub.f32 %v3738_v14, %v3740_v13 }
0x13d1   : > { %v3741_v21 = vsub.f32 %v3737_v18, %v3739_v17 }
0x13d2   : > { %v3746_v22 = vadd.f32 1e-05, %v3742_v20 }
0x13d3   : > { %v3745_v23 = vadd.f32 1e-05, %v3741_v21 }
0x13d4   : > { %5378 = vrsqrt.f32 %v3746_v22 }
0x13d5   : > { %5380 = vrsqrt.f32 %v3745_v23 }
0x13d6   : > { %v3869_v53 = vpop.permute.xlu0 (!%p4643_p5), %3868 }
0x13d7   : > { %vm3870_vm15 = vcmp.eq.s32.totalorder (!%p4643_p5), %v3869_v53, %v5588_v2 }
0x13d8   : > { %v4646_v56 = vsel (!%p4643_p5), %vm3870_vm15, 1.0, %v5439_v41 }
0x13da   : > { %v4083_v57 = vpop.permute.xlu0 (!%p4643_p5), %4082 }
0x13db   : > { %vm4084_vm0 = vcmp.eq.s32.totalorder (!%p4643_p5), %v4083_v57, %v5588_v2 }
0x13dc   : > { %v4651_v59 = vsel (!%p4643_p5), %vm4084_vm0, 1.0, %v5439_v41 }
0x13de   : > { %v5379_v25 = vpop.eup %5378 }
0x13df   : > { %v5381_v58 = vpop.eup %5380  ;;  %v3750_v28 = vmul.f32 %v5379_v25, %v3744_v24 }
0x13e0   : > { %v3749_v30 = vmul.f32 %v5381_v58, %v3743_v26  ;;  %3772 = sbr.rel (%p4643_p5) target bundleno = 5690 (0x163a), region = 124 }
0x13e1   : > { %v3758_v31 = vmul.f32 %v4641_v27, %v3750_v28 }
0x13e2   : > { %v3757_v32 = vmul.f32 %v4641_v27, %v3749_v30 }
0x13e3   : > { %v3766_v33 = vadd.f32 %v4642_v29, %v3758_v31 }
0x13e4   : > { %v3765_v34 = vadd.f32 %v4642_v29, %v3757_v32 }
0x13e5   : > { %3768 = vst.msk [vmem:[#allocation2 + $0x8] sm:$0xff] %vm1323_vm13, %v3766_v33 }
0x13e6   : > { %3767 = vst.msk [vmem:[#allocation2] sm:$0xff] %vm1323_vm13, %v3765_v34  ;;  %vm6008_vm13 = vmpackc.low (!%p4643_p5), %vm3879_vm10, %vm5440_vm12 }
0x13e7   : > { %5303 = vmatpush3.bf16.msk.msra.mxu1 %vm6008_vm13, %v5301_v50 }
0x13e8   : > { %5308 = vmatprep.subr.bf16.mxu1 %v5437_v16 }
0x13ea   : > { %5100 = vmatmul.mubr.msk.f32.vlgmr.msra.gmra.mrb[0].mxu1 %vm3875_vm14, %v4646_v56 }
0x13eb   : > { %5311 = vmatpush3.bf16.msk.msra.mxu1 %vm6008_vm13, %v5309_v55  ;;  %5113 = vmatprep.mubr.msk.f32.mxu1 %vm5438_vm9, %v5439_v41 }
0x13ec   : > { %v3774_v19 = vld [vmem:[#allocation2 + $0x8] sm:$0xff] }
0x13ed   : > { %v3773_v36 = vld [vmem:[#allocation2] sm:$0xff] }
0x13ee   : > { %v5298_v38 = vpack.c.bf16 %v3774_v19, %v3773_v36  ;;  %5114 = vmatmul.mubr.msk.f32.vlgmr.msra.gmra.mrb[2].mxu1 %vm3875_vm14, %v4651_v59 }
0x13f0   : > { %5299 = vmatpush3.bf16.msra.mxu0 %v5298_v38 }
0x13f1   : > { %5304 = vmatprep.subr.bf16.mxu0 %v5437_v16 }
0x13f3   : > { %5093 = vmatmul.mubr.msk.f32.vlgmr.msra.gmra.mrb[0].mxu0 %vm1665_vm7, %v4644_v47 }
0x13f4   : > { %5307 = vmatpush3.bf16.msk.msra.mxu0 %vm6008_vm13, %v5305_v45  ;;  %5106 = vmatprep.mubr.msk.f32.mxu0 %vm5438_vm9, %v5439_v41 }
0x13f5   : > { %5312 = vmatprep.subr.bf16.mxu0 %v5437_v16 }
0x13f7   : > { %5107 = vmatmul.mubr.msk.f32.vlgmr.msra.gmra.mrb[2].mxu0 %vm3875_vm14, %v4646_v56 }
0x13f8   : > { %5315 = vmatpush3.bf16.msk.msra.mxu0 %vm6008_vm13, %v5313_v54  ;;  %5120 = vmatprep.mubr.msk.f32.mxu0 %vm5438_vm9, %v5439_v41 }
0x13fb   : > { %5121 = vmatmul.mubr.msk.f32.vlgmr.msra.gmra.mrb[4].mxu0 %vm3875_vm14, %v4651_v59 }
0x14bd   : > { %v3949_v49 = vpop.f32.mrb[0].mxu1 }
0x14be   : > { %v5101_v10 = vpop.f32.mrb[1].mxu1 }
0x14c1   : > { %v4161_v13 = vpop.f32.mrb[2].mxu1 }
0x14c2   : > { %v5115_v20 = vpop.f32.mrb[3].mxu1 }
0x14c6   : > { %v3848_v60 = vpop.f32.mrb[0].mxu0 }
0x14c7   : > { %v3853_v61 = vand.u32 2147483647, %v3848_v60  ;;  %v5094_v62 = vpop.f32.mrb[1].mxu0  ;;  %v3852_v7 = vmax.f32 %v3848_v60, 0.0  ;;  %v4038_v9 = vmax.f32 %v3848_v60, %v3949_v49  ;;  %v4250_v17 = vmax.f32 %v3848_v60, %v4161_v13 }
0x14c9   : > { %v3854_v63 = vsub.f32 0.0, %v3853_v61 }
0x14ca   : > { %v4024_v42 = vpop.f32.mrb[2].mxu0 }
0x14cb   : > { %v3855_v0 = vmul.f32 1.442695, %v3854_v63  ;;  %v4029_v4 = vand.u32 2147483647, %v4024_v42  ;;  %v5108_v11 = vpop.f32.mrb[3].mxu0  ;;  %v4028_v28 = vmax.f32 %v4024_v42, 0.0 }
0x14cd   : > { %5383 = vpow2.f32 %v3855_v0  ;;  %v4030_v12 = vsub.f32 0.0, %v4029_v4 }
0x14ce   : > { %v4236_v14 = vpop.f32.mrb[4].mxu0 }
0x14cf   : > { %v4031_v15 = vmul.f32 1.442695, %v4030_v12  ;;  %v4241_v18 = vand.u32 2147483647, %v4236_v14  ;;  %v5122_v21 = vpop.f32.mrb[5].mxu0  ;;  %v4240_v33 = vmax.f32 %v4236_v14, 0.0 }
0x14d1   : > { %v4242_v22 = vsub.f32 0.0, %v4241_v18 }
0x14d3   : > { %v4243_v23 = vmul.f32 1.442695, %v4242_v22 }
0x14d7   : > { %v5384_v3 = vpop.eup %5383 }
0x14d8   : > { %v3857_v6 = vadd.f32 1.0, %v5384_v3 }
0x14da   : > { %5385 = vlog2.f32 %v3857_v6 }
0x14db   : > { %5387 = vpow2.f32 %v4031_v15 }
0x14dc   : > { %5389 = vpow2.f32 %v4243_v23 }
0x14e4   : > { %v5386_v5 = vpop.eup %5385 }
0x14e5   : > { %v3859_v8 = vmul.f32 0.6931472, %v5386_v5  ;;  %v5388_v24 = vpop.eup %5387 }
0x14e6   : > { %v4033_v25 = vadd.f32 1.0, %v5388_v24  ;;  %v5390_v26 = vpop.eup %5389 }
0x14e7   : > { %v3860_v2 = vadd.f32 %v3859_v8, %v3852_v7  ;;  %v4245_v27 = vadd.f32 1.0, %v5390_v26 }
0x14e8   : > { %5391 = vlog2.f32 %v4033_v25 }
0x14e9   : > { %3862 = vrot.lane.b32.xlu1 %v3860_v2, %s5441_s4  ;;  %5393 = vlog2.f32 %v4245_v27 }
0x14f2   : > { %v5392_v58 = vpop.eup %5391 }
0x14f3   : > { %v4035_v29 = vmul.f32 0.6931472, %v5392_v58  ;;  %v5394_v32 = vpop.eup %5393 }
0x14f4   : > { %v4247_v34 = vmul.f32 0.6931472, %v5394_v32 }
0x14f5   : > { %v4036_v31 = vadd.f32 %v4035_v29, %v4028_v28 }
0x14f6   : > { %v4248_v19 = vadd.f32 %v4247_v34, %v4240_v33 }
0x14f7   : > { %v4037_v36 = vadd.f32 %v4036_v31, %v3949_v49 }
0x14f8   : > { %v4249_v40 = vadd.f32 %v4248_v19, %v4161_v13 }
0x14f9   : > { %v4057_v16 = vsub.f32 %v4037_v36, %v3949_v49 }
0x14fa   : > { %v4268_v1 = vsub.f32 %v4249_v40, %v4161_v13 }
0x14fb   : > { %v4059_v39 = vand.u32 2147483647, %v4057_v16  ;;  %v4058_v6 = vmax.f32 %v4057_v16, 0.0 }
0x14fc   : > { %v4270_v48 = vand.u32 2147483647, %v4268_v1  ;;  %v4269_v11 = vmax.f32 %v4268_v1, 0.0 }
0x14fd   : > { %v4060_v43 = vsub.f32 0.0, %v4059_v39 }
0x14fe   : > { %v4271_v52 = vsub.f32 0.0, %v4270_v48 }
0x14ff   : > { %v4061_v46 = vmul.f32 1.442695, %v4060_v43 }
0x1500   : > { %v4272_v54 = vmul.f32 1.442695, %v4271_v52 }
0x1501   : > { %5395 = vpow2.f32 %v4061_v46 }
0x150b   : > { %v5396_v56 = vpop.eup %5395 }
0x150c   : > { %v4063_v57 = vadd.f32 1.0, %v5396_v56 }
0x155b   : > { %v3863_v30 = vpop.permute.xlu1 %3862 }
0x155c   : > { %v3865_v35 = vadd.f32 %v3863_v30, %v3848_v60 }
0x155e   : > { %v4039_v37 = vmin.f32 %v3865_v35, %v4037_v36  ;;  %v4251_v44 = vmin.f32 %v3865_v35, %v4249_v40 }
0x1560   : > { %v4040_v38 = vsub.f32 %v4039_v37, %v4038_v9  ;;  %v4252_v47 = vsub.f32 %v4251_v44, %v4250_v17 }
0x1562   : > { %v4042_v41 = vand.u32 2147483647, %v4040_v38  ;;  %v4254_v51 = vand.u32 2147483647, %v4252_v47  ;;  %v4041_v8 = vmax.f32 %v4040_v38, 0.0  ;;  %v4253_v13 = vmax.f32 %v4252_v47, 0.0 }
0x1564   : > { %v4043_v45 = vsub.f32 0.0, %v4042_v41  ;;  %v4255_v53 = vsub.f32 0.0, %v4254_v51 }
0x1566   : > { %v4044_v50 = vmul.f32 1.442695, %v4043_v45  ;;  %v4256_v55 = vmul.f32 1.442695, %v4255_v53 }
0x1568   : > { %5397 = vpow2.f32 %v4044_v50 }
0x1569   : > { %5399 = vpow2.f32 %v4272_v54 }
0x156a   : > { %5401 = vpow2.f32 %v4256_v55 }
0x156b   : > { %5403 = vlog2.f32 %v4063_v57 }
0x1572   : > { %v5398_v59 = vpop.eup %5397 }
0x1573   : > { %v4046_v60 = vadd.f32 1.0, %v5398_v59  ;;  %v5400_v61 = vpop.eup %5399 }
0x1574   : > { %v5402_v62 = vpop.eup %5401  ;;  %v4274_v63 = vadd.f32 1.0, %v5400_v61 }
0x1575   : > { %5405 = vlog2.f32 %v4046_v60  ;;  %v4258_v0 = vadd.f32 1.0, %v5402_v62  ;;  %v5404_v3 = vpop.eup %5403 }
0x1576   : > { %5407 = vlog2.f32 %v4274_v63  ;;  %v4065_v5 = vmul.f32 0.6931472, %v5404_v3 }
0x1577   : > { %5409 = vlog2.f32 %v4258_v0 }
0x1578   : > { %v4066_v2 = vadd.f32 %v4065_v5, %v4058_v6 }
0x157a   : > { %v4067_v9 = vadd.f32 1e-10, %v4066_v2 }
0x157c   : > { %5411 = vlog2.f32 %v4067_v9 }
0x157f   : > { %v5406_v7 = vpop.eup %5405 }
0x1580   : > { %v4048_v49 = vmul.f32 0.6931472, %v5406_v7  ;;  %v5408_v42 = vpop.eup %5407 }
0x1581   : > { %v5410_v10 = vpop.eup %5409  ;;  %v4276_v12 = vmul.f32 0.6931472, %v5408_v42 }
0x1582   : > { %v4049_v4 = vadd.f32 %v4048_v49, %v4041_v8  ;;  %v4260_v15 = vmul.f32 0.6931472, %v5410_v10 }
0x1583   : > { %v4277_v17 = vadd.f32 %v4276_v12, %v4269_v11 }
0x1584   : > { %v4050_v14 = vadd.f32 1e-10, %v4049_v4  ;;  %v4261_v18 = vadd.f32 %v4260_v15, %v4253_v13 }
0x1585   : > { %v4278_v20 = vadd.f32 1e-10, %v4277_v17 }
0x1586   : > { %5413 = vlog2.f32 %v4050_v14  ;;  %v4262_v21 = vadd.f32 1e-10, %v4261_v18  ;;  %v5412_v22 = vpop.eup %5411 }
0x1587   : > { %5415 = vlog2.f32 %v4278_v20  ;;  %v4069_v23 = vmul.f32 0.6931472, %v5412_v22 }
0x1588   : > { %5417 = vlog2.f32 %v4262_v21 }
0x1589   : > { %v4070_v25 = vsel %vm4053_vm1, %v4069_v23, 0.0 }
0x158a   : > { %4071 = vadd.xlane.f32.xlu0 %v4070_v25 }
0x1590   : > { %v5414_v24 = vpop.eup %5413 }
0x1591   : > { %v4052_v26 = vmul.f32 0.6931472, %v5414_v24  ;;  %v5416_v27 = vpop.eup %5415 }
0x1592   : > { %v5418_v28 = vpop.eup %5417  ;;  %v4280_v29 = vmul.f32 0.6931472, %v5416_v27 }
0x1593   : > { %v4054_v58 = vsel %vm4053_vm1, %v4052_v26, 0.0  ;;  %v4264_v30 = vmul.f32 0.6931472, %v5418_v28 }
0x1594   : > { %4055 = vadd.xlane.f32.xlu1 %v4054_v58  ;;  %v4281_v31 = vsel %vm4053_vm1, %v4280_v29, 0.0 }
0x1595   : > { %v4265_v32 = vsel %vm4053_vm1, %v4264_v30, 0.0 }
0x1596   : > { %4266 = vadd.xlane.f32.xlu0 %v4265_v32 }
0x1598   : > { %4282 = vadd.xlane.f32.xlu1 %v4281_v31 }
0x1617   : > { %v4072_v33 = vpop.xlane.xlu0 %4071 }
0x1621   : > { %v4056_v34 = vpop.xlane.xlu1 %4055 }
0x1622   : > { %v4073_v35 = vsub.f32 %v4056_v34, %v4072_v33 }
0x1623   : > { %v4267_v37 = vpop.xlane.xlu0 %4266 }
0x1624   : > { %v4074_v36 = vmul.f32 1.442695, %v4073_v35 }
0x1625   : > { %v4283_v19 = vpop.xlane.xlu1 %4282 }
0x1626   : > { %5419 = vpow2.f32 %v4074_v36  ;;  %v4284_v16 = vsub.f32 %v4267_v37, %v4283_v19 }
0x1628   : > { %v4285_v38 = vmul.f32 1.442695, %v4284_v16 }
0x162a   : > { %5421 = vpow2.f32 %v4285_v38 }
0x1630   : > { %v5420_v39 = vpop.eup %5419 }
0x1631   : > { %v4076_v40 = vmax.f32 %v5420_v39, 0.0 }
0x1633   : > { %v4077_v41 = vmin.f32 %v4076_v40, 1.0 }
0x1634   : > { %v5422_v43 = vpop.eup %5421 }
0x1635   : > { %4079 = vst.msk [vmem:[%s6132_s12] sm:$0x3] %vm4078_vm2, %v4077_v41  ;;  %v4287_v44 = vmax.f32 %v5422_v43, 0.0 }
0x1637   : > { %v4288_v1 = vmin.f32 %v4287_v44, 1.0 }
0x1639   : > { %4289 = vst.msk [vmem:[%s6133_s21] sm:$0x3] %vm4078_vm2, %v4288_v1 }
0x163a PF: > { %s6134_s25 = sld [smem:[#allocation3_spill]] }
0x1640   : > { %s36_s29 = sadd.s32 1, %s6134_s25  }
0x1641   : > { %p33_p6 = scmp.ge.s32.totalorder %s36_s29, 4  }
0x1643   :  { %35 = sbr.rel (!%p33_p6) target bundleno = 23 (0x17), region = 224 }

</bundles_post_ra>
